<compile_context>
chip_gen: v5e
topology: v5e:2x2
jax: 0.10.0
libtpu: 0.0.40
codegen_flags: <defaults>
</compile_context>

<pallas_src>
from functools import partial

import jax
import jax.numpy as jnp
import numpy as np
from jax.experimental import pallas as pl
from jax.experimental.pallas import tpu as pltpu


# ----------------------------------------------------------------------------
# Pallas kernel: full 2-layer RNN recurrence + fused FC for one batch block
# ----------------------------------------------------------------------------
def _rnn_fused_kernel(x_ref, wih0_ref, whh0_ref, wih1_ref, whh1_ref,
                      wfc_ref, b0_ref, b1_ref, bfc_ref, out_ref,
                      xp_ref, h1seq_ref):
    T, Bb, D_in = x_ref.shape
    H = whh0_ref.shape[0]          # lane-padded hidden size (multiple of 128)
    C = out_ref.shape[1]           # lane-padded num_classes (multiple of 128)
    mm_dtype = whh0_ref.dtype      # matmul operand dtype (f32 or bf16)

    # ---- hoisted layer-0 input projection (one big matmul, bias folded) ----
    x_flat = x_ref[...].reshape(T * Bb, D_in)          # sublane-aligned merge
    xp = jnp.dot(x_flat, wih0_ref[...], preferred_element_type=jnp.float32)
    xp_ref[...] = xp.reshape(T, Bb, H) + b0_ref[...]   # f32 scratch

    whh0 = whh0_ref[...]           # (H, H)  = W_hh0^T
    wih1 = wih1_ref[...]           # (H, H)  = W_ih1^T
    whh1 = whh1_ref[...]           # (H, H)  = W_hh1^T
    b1 = b1_ref[...]               # (1, H)  = b_ih1 + b_hh1  (f32)

    # Full unroll for short sequences; partial unroll bounds live ranges for
    # long ones (v5e has a single vector-store slot, spills hurt most there).
    unroll = True if T <= 16 else 8

    def step(t, carry):
        h0, h1 = carry                                  # f32 carries
        # layer 0: only the recurrent matmul is on the serial critical path
        h0n = jnp.tanh(xp_ref[t] +
                       jnp.dot(h0.astype(mm_dtype), whh0,
                               preferred_element_type=jnp.float32))
        # layer 1: two independent matmuls (no concat) -> h1 @ W_hh1^T can
        # issue while layer-0's tanh is still in the EUP.
        pre1 = (jnp.dot(h0n.astype(mm_dtype), wih1,
                        preferred_element_type=jnp.float32)
                + jnp.dot(h1.astype(mm_dtype), whh1,
                          preferred_element_type=jnp.float32)
                + b1)
        h1n = jnp.tanh(pre1)
        h1seq_ref[t] = h1n.astype(h1seq_ref.dtype)      # defer FC work
        return h0n, h1n

    h_init = jnp.zeros((Bb, H), jnp.float32)
    jax.lax.fori_loop(0, T, step, (h_init, h_init), unroll=unroll)

    # ---- deferred fused FC: Sum_t h1_t @ Wfc_t, off the serial path ----
    def fc_step(t, acc):
        return acc + jnp.dot(h1seq_ref[t], wfc_ref[t],
                             preferred_element_type=jnp.float32)

    acc = jax.lax.fori_loop(0, T, fc_step,
                            jnp.zeros((Bb, C), jnp.float32), unroll=unroll)
    out_ref[...] = acc + bfc_ref[...]


# ----------------------------------------------------------------------------
# Wrappers
# ----------------------------------------------------------------------------
def _round_up(x, m):
    return (x + m - 1) // m * m


def _pad_to(a, shape):
    return jnp.pad(a, [(0, s - d) for d, s in zip(a.shape, shape)])


def _detect_num_tensorcores():
    """Best-effort: 2 on v7x (two TCs per chip), 1 otherwise."""
    try:
        return max(1, int(getattr(jax.devices()[0], "num_cores", 1)))
    except Exception:
        return 1


def _choose_b_block(B, sub=8, num_cores=1, max_block=128):
    """Batch block: sublane-aligned; split so every TensorCore gets work.

    max_block can be raised to 256 on v6e/v7x for very large per-core batches.
    """
    blk = _round_up(B, sub)
    if num_cores > 1:
        per_core = _round_up(pl.cdiv(blk, num_cores), sub)
        blk = min(blk, per_core)
    return max(sub, min(blk, max_block))


def prepare_params(params, seq_len, matmul_dtype=jnp.float32):
    """One-time weight packing: transpose, lane-pad H/C to 128, cast weights.

    Padded hidden/class columns are zero, so they stay exactly 0 through the
    tanh recurrence and the FC contraction (numerics unchanged).
    """
    H = params["w_hh0"].shape[0]
    C = params["w_fc"].shape[0]
    D_in = params["w_ih0"].shape[1]
    Hp = _round_up(H, 128)
    Cp = _round_up(C, 128)

    wih0_t = _pad_to(jnp.asarray(params["w_ih0"]).T, (D_in, Hp))
    whh0_t = _pad_to(jnp.asarray(params["w_hh0"]).T, (Hp, Hp))
    wih1_t = _pad_to(jnp.asarray(params["w_ih1"]).T, (Hp, Hp))
    whh1_t = _pad_to(jnp.asarray(params["w_hh1"]).T, (Hp, Hp))
    wfc_t = _pad_to(jnp.asarray(params["w_fc"]).T.reshape(seq_len, H, C),
                    (seq_len, Hp, Cp))

    return {
        # MXU operands (optionally bf16; accumulation stays f32 in-kernel)
        "wih0_t": wih0_t.astype(matmul_dtype),
        "whh0_t": whh0_t.astype(matmul_dtype),
        "wih1_t": wih1_t.astype(matmul_dtype),
        "whh1_t": whh1_t.astype(matmul_dtype),
        "wfc_t": wfc_t.astype(matmul_dtype),
        # biases kept f32 (added post-matmul, not MXU operands)
        "b0": _pad_to((jnp.asarray(params["b_ih0"])
                       + jnp.asarray(params["b_hh0"])).reshape(1, H), (1, Hp)),
        "b1": _pad_to((jnp.asarray(params["b_ih1"])
                       + jnp.asarray(params["b_hh1"])).reshape(1, H), (1, Hp)),
        "bfc": _pad_to(jnp.asarray(params["b_fc"]).reshape(1, C), (1, Cp)),
    }


@partial(jax.jit, static_argnames=("num_classes", "num_cores"))
def rnn_forward_pallas(x, prep, num_classes, num_cores=1):
    """x: (B, T, D_in) float32.  Returns logits (B, num_classes) float32."""
    B, T, D_in = x.shape
    Hp = prep["whh0_t"].shape[0]
    Cp = prep["bfc"].shape[1]
    mm_dtype = prep["whh0_t"].dtype

    # bf16 packs 16 rows/sublane-tile -> keep batch blocks 16-aligned for bf16
    sub = 16 if mm_dtype == jnp.bfloat16 else 8
    b_block = _choose_b_block(B, sub=sub, num_cores=num_cores)
    B_pad = _round_up(B, b_block)
    nb = B_pad // b_block

    # time-major; no further host-side reshuffle (BlockSpec DMAs the slab)
    x_tm = jnp.transpose(x, (1, 0, 2))                  # (T, B, D_in)
    if B_pad != B:
        x_tm = jnp.pad(x_tm, ((0, 0), (0, B_pad - B), (0, 0)))
    x_tm = x_tm.astype(mm_dtype)

    full2d = lambda g: (0, 0)

    out = pl.pallas_call(
        _rnn_fused_kernel,
        out_shape=jax.ShapeDtypeStruct((B_pad, Cp), jnp.float32),
        grid_spec=pltpu.PrefetchScalarGridSpec(
            num_scalar_prefetch=0,
            grid=(nb,),
            in_specs=[
                pl.BlockSpec((T, b_block, D_in), lambda g: (0, g, 0)),  # x
                pl.BlockSpec((D_in, Hp), full2d),                       # Wih0^T
                pl.BlockSpec((Hp, Hp), full2d),                         # Whh0^T
                pl.BlockSpec((Hp, Hp), full2d),                         # Wih1^T
                pl.BlockSpec((Hp, Hp), full2d),                         # Whh1^T
                pl.BlockSpec((T, Hp, Cp), lambda g: (0, 0, 0)),         # Wfc
                pl.BlockSpec((1, Hp), full2d),                          # b0
                pl.BlockSpec((1, Hp), full2d),                          # b1
                pl.BlockSpec((1, Cp), full2d),                          # bfc
            ],
            out_specs=pl.BlockSpec((b_block, Cp), lambda g: (g, 0)),
            scratch_shapes=[
                pltpu.VMEM((T, b_block, Hp), jnp.float32),   # xp projection
                pltpu.VMEM((T, b_block, Hp), mm_dtype),      # h1 sequence
            ],
        ),
        compiler_params=pltpu.CompilerParams(
            dimension_semantics=("parallel",),       # batch blocks independent
            vmem_limit_bytes=64 * 1024 * 1024,       # headroom for full-size T/H
        ),
    )(x_tm, prep["wih0_t"], prep["whh0_t"], prep["wih1_t"], prep["whh1_t"],
      prep["wfc_t"], prep["b0"], prep["b1"], prep["bfc"])

    return out[:B, :num_classes]


def rnn_forward_reference(x, params):
    """Pure-JAX reference matching torch.nn.RNN (tanh) + Linear semantics."""
    B, T, D_in = x.shape
    H = params["w_hh0"].shape[0]
    h0 = jnp.zeros((B, H), jnp.float32)
    h1 = jnp.zeros((B, H), jnp.float32)
    outs = []
    for t in range(T):
        x_t = x[:, t, :]
        h0 = jnp.tanh(x_t @ params["w_ih0"].T + params["b_ih0"]
                      + h0 @ params["w_hh0"].T + params["b_hh0"])
        h1 = jnp.tanh(h0 @ params["w_ih1"].T + params["b_ih1"]
                      + h1 @ params["w_hh1"].T + params["b_hh1"])
        outs.append(h1)
    out = jnp.stack(outs, axis=1).reshape(B, -1)
    return out @ params["w_fc"].T + params["b_fc"]


def init_params(key, input_size, hidden_size, num_classes, seq_len):
    """Deterministic init, mimicking PyTorch's U(-1/sqrt(H), 1/sqrt(H))."""
    H = hidden_size
    k = 1.0 / np.sqrt(H)
    keys = jax.random.split(key, 10)
    u = lambda kk, shape: jax.random.uniform(kk, shape, jnp.float32, -k, k)
    kf = 1.0 / np.sqrt(seq_len * H)
    return {
        "w_ih0": u(keys[0], (H, input_size)),
        "w_hh0": u(keys[1], (H, H)),
        "b_ih0": u(keys[2], (H,)),
        "b_hh0": u(keys[3], (H,)),
        "w_ih1": u(keys[4], (H, H)),
        "w_hh1": u(keys[5], (H, H)),
        "b_ih1": u(keys[6], (H,)),
        "b_hh1": u(keys[7], (H,)),
        "w_fc": jax.random.uniform(keys[8], (num_classes, seq_len * H),
                                   jnp.float32, -kf, kf),
        "b_fc": jax.random.uniform(keys[9], (num_classes,),
                                   jnp.float32, -kf, kf),
    }


if __name__ == "__main__":
    # small shapes consistent with the module (module defaults: 256/28/10/2/28)
    batch = 2
    seq_len = 8
    input_size = 28
    hidden_size = 32
    num_classes = 10

    key = jax.random.PRNGKey(0)
    k_x, k_p = jax.random.split(key)
    x = jax.random.normal(k_x, (batch, seq_len, input_size), jnp.float32)
    params = init_params(k_p, input_size, hidden_size, num_classes, seq_len)
    ref = rnn_forward_reference(x, params)

    num_cores = _detect_num_tensorcores()

    # f32 matmul path (tight tolerance)
    prep_f32 = prepare_params(params, seq_len, matmul_dtype=jnp.float32)
    logits_f32 = jax.block_until_ready(
        rnn_forward_pallas(x, prep_f32, num_classes, num_cores=num_cores))
    np.testing.assert_allclose(np.asarray(logits_f32), np.asarray(ref),
                               rtol=1e-4, atol=1e-4)

    # bf16 MXU-operand path (f32 accumulation / carries) for v6e / v7x speed
    prep_bf16 = prepare_params(params, seq_len, matmul_dtype=jnp.bfloat16)
    logits_bf16 = jax.block_until_ready(
        rnn_forward_pallas(x, prep_bf16, num_classes, num_cores=num_cores))
    np.testing.assert_allclose(np.asarray(logits_bf16), np.asarray(ref),
                               rtol=5e-2, atol=5e-2)

    print("KERNEL_OK")
</pallas_src>

<mosaic_0001>
module attributes {stable_mosaic.version = 11 : i64} {
  func.func @_rnn_fused_kernel(%arg0: i32, %arg1: memref<8x8x28xf32, #tpu.memory_space<vmem>>, %arg2: memref<28x128xf32, #tpu.memory_space<vmem>>, %arg3: memref<128x128xf32, #tpu.memory_space<vmem>>, %arg4: memref<128x128xf32, #tpu.memory_space<vmem>>, %arg5: memref<128x128xf32, #tpu.memory_space<vmem>>, %arg6: memref<8x128x128xf32, #tpu.memory_space<vmem>>, %arg7: memref<1x128xf32, #tpu.memory_space<vmem>>, %arg8: memref<1x128xf32, #tpu.memory_space<vmem>>, %arg9: memref<1x128xf32, #tpu.memory_space<vmem>>, %arg10: memref<8x128xf32, #tpu.memory_space<vmem>>, %arg11: memref<8x8x128xf32, #tpu.memory_space<vmem>>, %arg12: memref<8x8x128xf32, #tpu.memory_space<vmem>>) attributes {dimension_semantics = [#tpu.dimension_semantics<parallel>], iteration_bounds = array<i64: 1>, scalar_prefetch = 0 : i64, scratch_operands = 2 : i64, tpu.core_type = #tpu.core_type<tc>, window_params = [{transform_indices = @transform_0, window_bounds = array<i64: 8, 8, 28>}, {pipeline_mode = #tpu.pipeline_mode<synchronous>, transform_indices = @transform_1, window_bounds = array<i64: 28, 128>}, {pipeline_mode = #tpu.pipeline_mode<synchronous>, transform_indices = @transform_2, window_bounds = array<i64: 128, 128>}, {pipeline_mode = #tpu.pipeline_mode<synchronous>, transform_indices = @transform_3, window_bounds = array<i64: 128, 128>}, {pipeline_mode = #tpu.pipeline_mode<synchronous>, transform_indices = @transform_4, window_bounds = array<i64: 128, 128>}, {pipeline_mode = #tpu.pipeline_mode<synchronous>, transform_indices = @transform_5, window_bounds = array<i64: 8, 128, 128>}, {pipeline_mode = #tpu.pipeline_mode<synchronous>, transform_indices = @transform_6, window_bounds = array<i64: 1, 128>}, {pipeline_mode = #tpu.pipeline_mode<synchronous>, transform_indices = @transform_7, window_bounds = array<i64: 1, 128>}, {pipeline_mode = #tpu.pipeline_mode<synchronous>, transform_indices = @transform_8, window_bounds = array<i64: 1, 128>}, {transform_indices = @transform_9, window_bounds = array<i64: 8, 128>}]} {
    %c0 = arith.constant 0 : index
    %c0_0 = arith.constant 0 : index
    %c0_1 = arith.constant 0 : index
    %0 = vector.load %arg1[%c0, %c0_0, %c0_1] : memref<8x8x28xf32, #tpu.memory_space<vmem>>, vector<8x8x28xf32>
    %1 = vector.shape_cast %0 : vector<8x8x28xf32> to vector<64x28xf32>
    %c0_2 = arith.constant 0 : index
    %c0_3 = arith.constant 0 : index
    %2 = vector.load %arg2[%c0_2, %c0_3] : memref<28x128xf32, #tpu.memory_space<vmem>>, vector<28x128xf32>
    %cst = arith.constant dense<0.000000e+00> : vector<64x128xf32>
    %3 = tpu.matmul %1, %2, %cst {dimension_numbers = #tpu.dot_dimension_numbers<[1], [0], [0], [1], [0, 0, 1, 1], [], []>} : vector<64x28xf32>, vector<28x128xf32>, vector<64x128xf32> -> vector<64x128xf32>
    %4 = vector.shape_cast %3 : vector<64x128xf32> to vector<8x8x128xf32>
    %c0_4 = arith.constant 0 : index
    %c0_5 = arith.constant 0 : index
    %5 = vector.load %arg7[%c0_4, %c0_5] : memref<1x128xf32, #tpu.memory_space<vmem>>, vector<1x128xf32>
    %6 = vector.shape_cast %5 : vector<1x128xf32> to vector<1x1x128xf32>
    %7 = vector.broadcast %6 : vector<1x1x128xf32> to vector<8x8x128xf32>
    %8 = arith.addf %4, %7 : vector<8x8x128xf32>
    %c0_6 = arith.constant 0 : index
    %c0_7 = arith.constant 0 : index
    %c0_8 = arith.constant 0 : index
    %9 = vector.load %arg11[%c0_6, %c0_7, %c0_8] : memref<8x8x128xf32, #tpu.memory_space<vmem>>, vector<8x8x128xf32>
    tpu.vector_store %arg11[%c0_6, %c0_7, %c0_8], %8 {strides = array<i32>} : memref<8x8x128xf32, #tpu.memory_space<vmem>>, vector<8x8x128xf32>,
    %c0_9 = arith.constant 0 : index
    %c0_10 = arith.constant 0 : index
    %10 = vector.load %arg3[%c0_9, %c0_10] : memref<128x128xf32, #tpu.memory_space<vmem>>, vector<128x128xf32>
    %c0_11 = arith.constant 0 : index
    %c0_12 = arith.constant 0 : index
    %11 = vector.load %arg4[%c0_11, %c0_12] : memref<128x128xf32, #tpu.memory_space<vmem>>, vector<128x128xf32>
    %c0_13 = arith.constant 0 : index
    %c0_14 = arith.constant 0 : index
    %12 = vector.load %arg5[%c0_13, %c0_14] : memref<128x128xf32, #tpu.memory_space<vmem>>, vector<128x128xf32>
    %c0_15 = arith.constant 0 : index
    %c0_16 = arith.constant 0 : index
    %13 = vector.load %arg8[%c0_15, %c0_16] : memref<1x128xf32, #tpu.memory_space<vmem>>, vector<1x128xf32>
    %cst_17 = arith.constant 0.000000e+00 : f32
    %14 = vector.broadcast %cst_17 : f32 to vector<8x128xf32>
    %c0_i32 = arith.constant 0 : i32
    %15 = arith.index_cast %c0_i32 : i32 to index
    %c0_18 = arith.constant 0 : index
    %c0_19 = arith.constant 0 : index
    %16 = vector.load %arg11[%15, %c0_18, %c0_19] : memref<8x8x128xf32, #tpu.memory_space<vmem>>, vector<1x8x128xf32>
    %17 = vector.shape_cast %16 : vector<1x8x128xf32> to vector<8x128xf32>
    %cst_20 = arith.constant dense<0.000000e+00> : vector<8x128xf32>
    %18 = tpu.matmul %14, %10, %cst_20 {dimension_numbers = #tpu.dot_dimension_numbers<[1], [0], [0], [1], [0, 0, 1, 1], [], []>} : vector<8x128xf32>, vector<128x128xf32>, vector<8x128xf32> -> vector<8x128xf32>
    %19 = arith.addf %17, %18 : vector<8x128xf32>
    %20 = math.tanh %19 : vector<8x128xf32>
    %cst_21 = arith.constant dense<0.000000e+00> : vector<8x128xf32>
    %21 = tpu.matmul %20, %11, %cst_21 {dimension_numbers = #tpu.dot_dimension_numbers<[1], [0], [0], [1], [0, 0, 1, 1], [], []>} : vector<8x128xf32>, vector<128x128xf32>, vector<8x128xf32> -> vector<8x128xf32>
    %cst_22 = arith.constant dense<0.000000e+00> : vector<8x128xf32>
    %22 = tpu.matmul %14, %12, %cst_22 {dimension_numbers = #tpu.dot_dimension_numbers<[1], [0], [0], [1], [0, 0, 1, 1], [], []>} : vector<8x128xf32>, vector<128x128xf32>, vector<8x128xf32> -> vector<8x128xf32>
    %23 = arith.addf %21, %22 : vector<8x128xf32>
    %24 = vector.broadcast %13 : vector<1x128xf32> to vector<8x128xf32>
    %25 = arith.addf %23, %24 : vector<8x128xf32>
    %26 = math.tanh %25 : vector<8x128xf32>
    %27 = arith.index_cast %c0_i32 : i32 to index
    %c0_23 = arith.constant 0 : index
    %c0_24 = arith.constant 0 : index
    %28 = vector.load %arg12[%27, %c0_23, %c0_24] : memref<8x8x128xf32, #tpu.memory_space<vmem>>, vector<1x8x128xf32>
    %29 = vector.shape_cast %28 : vector<1x8x128xf32> to vector<8x128xf32>
    %30 = vector.shape_cast %26 : vector<8x128xf32> to vector<1x8x128xf32>
    tpu.vector_store %arg12[%27, %c0_23, %c0_24], %30 {strides = array<i32>} : memref<8x8x128xf32, #tpu.memory_space<vmem>>, vector<1x8x128xf32>,
    %c1_i32 = arith.constant 1 : i32
    %31 = arith.index_cast %c1_i32 : i32 to index
    %c0_25 = arith.constant 0 : index
    %c0_26 = arith.constant 0 : index
    %32 = vector.load %arg11[%31, %c0_25, %c0_26] : memref<8x8x128xf32, #tpu.memory_space<vmem>>, vector<1x8x128xf32>
    %33 = vector.shape_cast %32 : vector<1x8x128xf32> to vector<8x128xf32>
    %cst_27 = arith.constant dense<0.000000e+00> : vector<8x128xf32>
    %34 = tpu.matmul %20, %10, %cst_27 {dimension_numbers = #tpu.dot_dimension_numbers<[1], [0], [0], [1], [0, 0, 1, 1], [], []>} : vector<8x128xf32>, vector<128x128xf32>, vector<8x128xf32> -> vector<8x128xf32>
    %35 = arith.addf %33, %34 : vector<8x128xf32>
    %36 = math.tanh %35 : vector<8x128xf32>
    %cst_28 = arith.constant dense<0.000000e+00> : vector<8x128xf32>
    %37 = tpu.matmul %36, %11, %cst_28 {dimension_numbers = #tpu.dot_dimension_numbers<[1], [0], [0], [1], [0, 0, 1, 1], [], []>} : vector<8x128xf32>, vector<128x128xf32>, vector<8x128xf32> -> vector<8x128xf32>
    %cst_29 = arith.constant dense<0.000000e+00> : vector<8x128xf32>
    %38 = tpu.matmul %26, %12, %cst_29 {dimension_numbers = #tpu.dot_dimension_numbers<[1], [0], [0], [1], [0, 0, 1, 1], [], []>} : vector<8x128xf32>, vector<128x128xf32>, vector<8x128xf32> -> vector<8x128xf32>
    %39 = arith.addf %37, %38 : vector<8x128xf32>
    %40 = vector.broadcast %13 : vector<1x128xf32> to vector<8x128xf32>
    %41 = arith.addf %39, %40 : vector<8x128xf32>
    %42 = math.tanh %41 : vector<8x128xf32>
    %43 = arith.index_cast %c1_i32 : i32 to index
    %c0_30 = arith.constant 0 : index
    %c0_31 = arith.constant 0 : index
    %44 = vector.load %arg12[%43, %c0_30, %c0_31] : memref<8x8x128xf32, #tpu.memory_space<vmem>>, vector<1x8x128xf32>
    %45 = vector.shape_cast %44 : vector<1x8x128xf32> to vector<8x128xf32>
    %46 = vector.shape_cast %42 : vector<8x128xf32> to vector<1x8x128xf32>
    tpu.vector_store %arg12[%43, %c0_30, %c0_31], %46 {strides = array<i32>} : memref<8x8x128xf32, #tpu.memory_space<vmem>>, vector<1x8x128xf32>,
    %c2_i32 = arith.constant 2 : i32
    %47 = arith.index_cast %c2_i32 : i32 to index
    %c0_32 = arith.constant 0 : index
    %c0_33 = arith.constant 0 : index
    %48 = vector.load %arg11[%47, %c0_32, %c0_33] : memref<8x8x128xf32, #tpu.memory_space<vmem>>, vector<1x8x128xf32>
    %49 = vector.shape_cast %48 : vector<1x8x128xf32> to vector<8x128xf32>
    %cst_34 = arith.constant dense<0.000000e+00> : vector<8x128xf32>
    %50 = tpu.matmul %36, %10, %cst_34 {dimension_numbers = #tpu.dot_dimension_numbers<[1], [0], [0], [1], [0, 0, 1, 1], [], []>} : vector<8x128xf32>, vector<128x128xf32>, vector<8x128xf32> -> vector<8x128xf32>
    %51 = arith.addf %49, %50 : vector<8x128xf32>
    %52 = math.tanh %51 : vector<8x128xf32>
    %cst_35 = arith.constant dense<0.000000e+00> : vector<8x128xf32>
    %53 = tpu.matmul %52, %11, %cst_35 {dimension_numbers = #tpu.dot_dimension_numbers<[1], [0], [0], [1], [0, 0, 1, 1], [], []>} : vector<8x128xf32>, vector<128x128xf32>, vector<8x128xf32> -> vector<8x128xf32>
    %cst_36 = arith.constant dense<0.000000e+00> : vector<8x128xf32>
    %54 = tpu.matmul %42, %12, %cst_36 {dimension_numbers = #tpu.dot_dimension_numbers<[1], [0], [0], [1], [0, 0, 1, 1], [], []>} : vector<8x128xf32>, vector<128x128xf32>, vector<8x128xf32> -> vector<8x128xf32>
    %55 = arith.addf %53, %54 : vector<8x128xf32>
    %56 = vector.broadcast %13 : vector<1x128xf32> to vector<8x128xf32>
    %57 = arith.addf %55, %56 : vector<8x128xf32>
    %58 = math.tanh %57 : vector<8x128xf32>
    %59 = arith.index_cast %c2_i32 : i32 to index
    %c0_37 = arith.constant 0 : index
    %c0_38 = arith.constant 0 : index
    %60 = vector.load %arg12[%59, %c0_37, %c0_38] : memref<8x8x128xf32, #tpu.memory_space<vmem>>, vector<1x8x128xf32>
    %61 = vector.shape_cast %60 : vector<1x8x128xf32> to vector<8x128xf32>
    %62 = vector.shape_cast %58 : vector<8x128xf32> to vector<1x8x128xf32>
    tpu.vector_store %arg12[%59, %c0_37, %c0_38], %62 {strides = array<i32>} : memref<8x8x128xf32, #tpu.memory_space<vmem>>, vector<1x8x128xf32>,
    %c3_i32 = arith.constant 3 : i32
    %63 = arith.index_cast %c3_i32 : i32 to index
    %c0_39 = arith.constant 0 : index
    %c0_40 = arith.constant 0 : index
    %64 = vector.load %arg11[%63, %c0_39, %c0_40] : memref<8x8x128xf32, #tpu.memory_space<vmem>>, vector<1x8x128xf32>
    %65 = vector.shape_cast %64 : vector<1x8x128xf32> to vector<8x128xf32>
    %cst_41 = arith.constant dense<0.000000e+00> : vector<8x128xf32>
    %66 = tpu.matmul %52, %10, %cst_41 {dimension_numbers = #tpu.dot_dimension_numbers<[1], [0], [0], [1], [0, 0, 1, 1], [], []>} : vector<8x128xf32>, vector<128x128xf32>, vector<8x128xf32> -> vector<8x128xf32>
    %67 = arith.addf %65, %66 : vector<8x128xf32>
    %68 = math.tanh %67 : vector<8x128xf32>
    %cst_42 = arith.constant dense<0.000000e+00> : vector<8x128xf32>
    %69 = tpu.matmul %68, %11, %cst_42 {dimension_numbers = #tpu.dot_dimension_numbers<[1], [0], [0], [1], [0, 0, 1, 1], [], []>} : vector<8x128xf32>, vector<128x128xf32>, vector<8x128xf32> -> vector<8x128xf32>
    %cst_43 = arith.constant dense<0.000000e+00> : vector<8x128xf32>
    %70 = tpu.matmul %58, %12, %cst_43 {dimension_numbers = #tpu.dot_dimension_numbers<[1], [0], [0], [1], [0, 0, 1, 1], [], []>} : vector<8x128xf32>, vector<128x128xf32>, vector<8x128xf32> -> vector<8x128xf32>
    %71 = arith.addf %69, %70 : vector<8x128xf32>
    %72 = vector.broadcast %13 : vector<1x128xf32> to vector<8x128xf32>
    %73 = arith.addf %71, %72 : vector<8x128xf32>
    %74 = math.tanh %73 : vector<8x128xf32>
    %75 = arith.index_cast %c3_i32 : i32 to index
    %c0_44 = arith.constant 0 : index
    %c0_45 = arith.constant 0 : index
    %76 = vector.load %arg12[%75, %c0_44, %c0_45] : memref<8x8x128xf32, #tpu.memory_space<vmem>>, vector<1x8x128xf32>
    %77 = vector.shape_cast %76 : vector<1x8x128xf32> to vector<8x128xf32>
    %78 = vector.shape_cast %74 : vector<8x128xf32> to vector<1x8x128xf32>
    tpu.vector_store %arg12[%75, %c0_44, %c0_45], %78 {strides = array<i32>} : memref<8x8x128xf32, #tpu.memory_space<vmem>>, vector<1x8x128xf32>,
    %c4_i32 = arith.constant 4 : i32
    %79 = arith.index_cast %c4_i32 : i32 to index
    %c0_46 = arith.constant 0 : index
    %c0_47 = arith.constant 0 : index
    %80 = vector.load %arg11[%79, %c0_46, %c0_47] : memref<8x8x128xf32, #tpu.memory_space<vmem>>, vector<1x8x128xf32>
    %81 = vector.shape_cast %80 : vector<1x8x128xf32> to vector<8x128xf32>
    %cst_48 = arith.constant dense<0.000000e+00> : vector<8x128xf32>
    %82 = tpu.matmul %68, %10, %cst_48 {dimension_numbers = #tpu.dot_dimension_numbers<[1], [0], [0], [1], [0, 0, 1, 1], [], []>} : vector<8x128xf32>, vector<128x128xf32>, vector<8x128xf32> -> vector<8x128xf32>
    %83 = arith.addf %81, %82 : vector<8x128xf32>
    %84 = math.tanh %83 : vector<8x128xf32>
    %cst_49 = arith.constant dense<0.000000e+00> : vector<8x128xf32>
    %85 = tpu.matmul %84, %11, %cst_49 {dimension_numbers = #tpu.dot_dimension_numbers<[1], [0], [0], [1], [0, 0, 1, 1], [], []>} : vector<8x128xf32>, vector<128x128xf32>, vector<8x128xf32> -> vector<8x128xf32>
    %cst_50 = arith.constant dense<0.000000e+00> : vector<8x128xf32>
    %86 = tpu.matmul %74, %12, %cst_50 {dimension_numbers = #tpu.dot_dimension_numbers<[1], [0], [0], [1], [0, 0, 1, 1], [], []>} : vector<8x128xf32>, vector<128x128xf32>, vector<8x128xf32> -> vector<8x128xf32>
    %87 = arith.addf %85, %86 : vector<8x128xf32>
    %88 = vector.broadcast %13 : vector<1x128xf32> to vector<8x128xf32>
    %89 = arith.addf %87, %88 : vector<8x128xf32>
    %90 = math.tanh %89 : vector<8x128xf32>
    %91 = arith.index_cast %c4_i32 : i32 to index
    %c0_51 = arith.constant 0 : index
    %c0_52 = arith.constant 0 : index
    %92 = vector.load %arg12[%91, %c0_51, %c0_52] : memref<8x8x128xf32, #tpu.memory_space<vmem>>, vector<1x8x128xf32>
    %93 = vector.shape_cast %92 : vector<1x8x128xf32> to vector<8x128xf32>
    %94 = vector.shape_cast %90 : vector<8x128xf32> to vector<1x8x128xf32>
    tpu.vector_store %arg12[%91, %c0_51, %c0_52], %94 {strides = array<i32>} : memref<8x8x128xf32, #tpu.memory_space<vmem>>, vector<1x8x128xf32>,
    %c5_i32 = arith.constant 5 : i32
    %95 = arith.index_cast %c5_i32 : i32 to index
    %c0_53 = arith.constant 0 : index
    %c0_54 = arith.constant 0 : index
    %96 = vector.load %arg11[%95, %c0_53, %c0_54] : memref<8x8x128xf32, #tpu.memory_space<vmem>>, vector<1x8x128xf32>
    %97 = vector.shape_cast %96 : vector<1x8x128xf32> to vector<8x128xf32>
    %cst_55 = arith.constant dense<0.000000e+00> : vector<8x128xf32>
    %98 = tpu.matmul %84, %10, %cst_55 {dimension_numbers = #tpu.dot_dimension_numbers<[1], [0], [0], [1], [0, 0, 1, 1], [], []>} : vector<8x128xf32>, vector<128x128xf32>, vector<8x128xf32> -> vector<8x128xf32>
    %99 = arith.addf %97, %98 : vector<8x128xf32>
    %100 = math.tanh %99 : vector<8x128xf32>
    %cst_56 = arith.constant dense<0.000000e+00> : vector<8x128xf32>
    %101 = tpu.matmul %100, %11, %cst_56 {dimension_numbers = #tpu.dot_dimension_numbers<[1], [0], [0], [1], [0, 0, 1, 1], [], []>} : vector<8x128xf32>, vector<128x128xf32>, vector<8x128xf32> -> vector<8x128xf32>
    %cst_57 = arith.constant dense<0.000000e+00> : vector<8x128xf32>
    %102 = tpu.matmul %90, %12, %cst_57 {dimension_numbers = #tpu.dot_dimension_numbers<[1], [0], [0], [1], [0, 0, 1, 1], [], []>} : vector<8x128xf32>, vector<128x128xf32>, vector<8x128xf32> -> vector<8x128xf32>
    %103 = arith.addf %101, %102 : vector<8x128xf32>
    %104 = vector.broadcast %13 : vector<1x128xf32> to vector<8x128xf32>
    %105 = arith.addf %103, %104 : vector<8x128xf32>
    %106 = math.tanh %105 : vector<8x128xf32>
    %107 = arith.index_cast %c5_i32 : i32 to index
    %c0_58 = arith.constant 0 : index
    %c0_59 = arith.constant 0 : index
    %108 = vector.load %arg12[%107, %c0_58, %c0_59] : memref<8x8x128xf32, #tpu.memory_space<vmem>>, vector<1x8x128xf32>
    %109 = vector.shape_cast %108 : vector<1x8x128xf32> to vector<8x128xf32>
    %110 = vector.shape_cast %106 : vector<8x128xf32> to vector<1x8x128xf32>
    tpu.vector_store %arg12[%107, %c0_58, %c0_59], %110 {strides = array<i32>} : memref<8x8x128xf32, #tpu.memory_space<vmem>>, vector<1x8x128xf32>,
    %c6_i32 = arith.constant 6 : i32
    %111 = arith.index_cast %c6_i32 : i32 to index
    %c0_60 = arith.constant 0 : index
    %c0_61 = arith.constant 0 : index
    %112 = vector.load %arg11[%111, %c0_60, %c0_61] : memref<8x8x128xf32, #tpu.memory_space<vmem>>, vector<1x8x128xf32>
    %113 = vector.shape_cast %112 : vector<1x8x128xf32> to vector<8x128xf32>
    %cst_62 = arith.constant dense<0.000000e+00> : vector<8x128xf32>
    %114 = tpu.matmul %100, %10, %cst_62 {dimension_numbers = #tpu.dot_dimension_numbers<[1], [0], [0], [1], [0, 0, 1, 1], [], []>} : vector<8x128xf32>, vector<128x128xf32>, vector<8x128xf32> -> vector<8x128xf32>
    %115 = arith.addf %113, %114 : vector<8x128xf32>
    %116 = math.tanh %115 : vector<8x128xf32>
    %cst_63 = arith.constant dense<0.000000e+00> : vector<8x128xf32>
    %117 = tpu.matmul %116, %11, %cst_63 {dimension_numbers = #tpu.dot_dimension_numbers<[1], [0], [0], [1], [0, 0, 1, 1], [], []>} : vector<8x128xf32>, vector<128x128xf32>, vector<8x128xf32> -> vector<8x128xf32>
    %cst_64 = arith.constant dense<0.000000e+00> : vector<8x128xf32>
    %118 = tpu.matmul %106, %12, %cst_64 {dimension_numbers = #tpu.dot_dimension_numbers<[1], [0], [0], [1], [0, 0, 1, 1], [], []>} : vector<8x128xf32>, vector<128x128xf32>, vector<8x128xf32> -> vector<8x128xf32>
    %119 = arith.addf %117, %118 : vector<8x128xf32>
    %120 = vector.broadcast %13 : vector<1x128xf32> to vector<8x128xf32>
    %121 = arith.addf %119, %120 : vector<8x128xf32>
    %122 = math.tanh %121 : vector<8x128xf32>
    %123 = arith.index_cast %c6_i32 : i32 to index
    %c0_65 = arith.constant 0 : index
    %c0_66 = arith.constant 0 : index
    %124 = vector.load %arg12[%123, %c0_65, %c0_66] : memref<8x8x128xf32, #tpu.memory_space<vmem>>, vector<1x8x128xf32>
    %125 = vector.shape_cast %124 : vector<1x8x128xf32> to vector<8x128xf32>
    %126 = vector.shape_cast %122 : vector<8x128xf32> to vector<1x8x128xf32>
    tpu.vector_store %arg12[%123, %c0_65, %c0_66], %126 {strides = array<i32>} : memref<8x8x128xf32, #tpu.memory_space<vmem>>, vector<1x8x128xf32>,
    %c7_i32 = arith.constant 7 : i32
    %127 = arith.index_cast %c7_i32 : i32 to index
    %c0_67 = arith.constant 0 : index
    %c0_68 = arith.constant 0 : index
    %128 = vector.load %arg11[%127, %c0_67, %c0_68] : memref<8x8x128xf32, #tpu.memory_space<vmem>>, vector<1x8x128xf32>
    %129 = vector.shape_cast %128 : vector<1x8x128xf32> to vector<8x128xf32>
    %cst_69 = arith.constant dense<0.000000e+00> : vector<8x128xf32>
    %130 = tpu.matmul %116, %10, %cst_69 {dimension_numbers = #tpu.dot_dimension_numbers<[1], [0], [0], [1], [0, 0, 1, 1], [], []>} : vector<8x128xf32>, vector<128x128xf32>, vector<8x128xf32> -> vector<8x128xf32>
    %131 = arith.addf %129, %130 : vector<8x128xf32>
    %132 = math.tanh %131 : vector<8x128xf32>
    %cst_70 = arith.constant dense<0.000000e+00> : vector<8x128xf32>
    %133 = tpu.matmul %132, %11, %cst_70 {dimension_numbers = #tpu.dot_dimension_numbers<[1], [0], [0], [1], [0, 0, 1, 1], [], []>} : vector<8x128xf32>, vector<128x128xf32>, vector<8x128xf32> -> vector<8x128xf32>
    %cst_71 = arith.constant dense<0.000000e+00> : vector<8x128xf32>
    %134 = tpu.matmul %122, %12, %cst_71 {dimension_numbers = #tpu.dot_dimension_numbers<[1], [0], [0], [1], [0, 0, 1, 1], [], []>} : vector<8x128xf32>, vector<128x128xf32>, vector<8x128xf32> -> vector<8x128xf32>
    %135 = arith.addf %133, %134 : vector<8x128xf32>
    %136 = vector.broadcast %13 : vector<1x128xf32> to vector<8x128xf32>
    %137 = arith.addf %135, %136 : vector<8x128xf32>
    %138 = math.tanh %137 : vector<8x128xf32>
    %139 = arith.index_cast %c7_i32 : i32 to index
    %c0_72 = arith.constant 0 : index
    %c0_73 = arith.constant 0 : index
    %140 = vector.load %arg12[%139, %c0_72, %c0_73] : memref<8x8x128xf32, #tpu.memory_space<vmem>>, vector<1x8x128xf32>
    %141 = vector.shape_cast %140 : vector<1x8x128xf32> to vector<8x128xf32>
    %142 = vector.shape_cast %138 : vector<8x128xf32> to vector<1x8x128xf32>
    tpu.vector_store %arg12[%139, %c0_72, %c0_73], %142 {strides = array<i32>} : memref<8x8x128xf32, #tpu.memory_space<vmem>>, vector<1x8x128xf32>,
    %c8_i32 = arith.constant 8 : i32
    %cst_74 = arith.constant 0.000000e+00 : f32
    %143 = vector.broadcast %cst_74 : f32 to vector<8x128xf32>
    %c0_i32_75 = arith.constant 0 : i32
    %144 = arith.index_cast %c0_i32_75 : i32 to index
    %c0_76 = arith.constant 0 : index
    %c0_77 = arith.constant 0 : index
    %145 = vector.load %arg12[%144, %c0_76, %c0_77] : memref<8x8x128xf32, #tpu.memory_space<vmem>>, vector<1x8x128xf32>
    %146 = vector.shape_cast %145 : vector<1x8x128xf32> to vector<8x128xf32>
    %147 = arith.index_cast %c0_i32_75 : i32 to index
    %c0_78 = arith.constant 0 : index
    %c0_79 = arith.constant 0 : index
    %148 = vector.load %arg6[%147, %c0_78, %c0_79] : memref<8x128x128xf32, #tpu.memory_space<vmem>>, vector<1x128x128xf32>
    %149 = vector.shape_cast %148 : vector<1x128x128xf32> to vector<128x128xf32>
    %cst_80 = arith.constant dense<0.000000e+00> : vector<8x128xf32>
    %150 = tpu.matmul %146, %149, %cst_80 {dimension_numbers = #tpu.dot_dimension_numbers<[1], [0], [0], [1], [0, 0, 1, 1], [], []>} : vector<8x128xf32>, vector<128x128xf32>, vector<8x128xf32> -> vector<8x128xf32>
    %151 = arith.addf %143, %150 : vector<8x128xf32>
    %c1_i32_81 = arith.constant 1 : i32
    %152 = arith.index_cast %c1_i32_81 : i32 to index
    %c0_82 = arith.constant 0 : index
    %c0_83 = arith.constant 0 : index
    %153 = vector.load %arg12[%152, %c0_82, %c0_83] : memref<8x8x128xf32, #tpu.memory_space<vmem>>, vector<1x8x128xf32>
    %154 = vector.shape_cast %153 : vector<1x8x128xf32> to vector<8x128xf32>
    %155 = arith.index_cast %c1_i32_81 : i32 to index
    %c0_84 = arith.constant 0 : index
    %c0_85 = arith.constant 0 : index
    %156 = vector.load %arg6[%155, %c0_84, %c0_85] : memref<8x128x128xf32, #tpu.memory_space<vmem>>, vector<1x128x128xf32>
    %157 = vector.shape_cast %156 : vector<1x128x128xf32> to vector<128x128xf32>
    %cst_86 = arith.constant dense<0.000000e+00> : vector<8x128xf32>
    %158 = tpu.matmul %154, %157, %cst_86 {dimension_numbers = #tpu.dot_dimension_numbers<[1], [0], [0], [1], [0, 0, 1, 1], [], []>} : vector<8x128xf32>, vector<128x128xf32>, vector<8x128xf32> -> vector<8x128xf32>
    %159 = arith.addf %151, %158 : vector<8x128xf32>
    %c2_i32_87 = arith.constant 2 : i32
    %160 = arith.index_cast %c2_i32_87 : i32 to index
    %c0_88 = arith.constant 0 : index
    %c0_89 = arith.constant 0 : index
    %161 = vector.load %arg12[%160, %c0_88, %c0_89] : memref<8x8x128xf32, #tpu.memory_space<vmem>>, vector<1x8x128xf32>
    %162 = vector.shape_cast %161 : vector<1x8x128xf32> to vector<8x128xf32>
    %163 = arith.index_cast %c2_i32_87 : i32 to index
    %c0_90 = arith.constant 0 : index
    %c0_91 = arith.constant 0 : index
    %164 = vector.load %arg6[%163, %c0_90, %c0_91] : memref<8x128x128xf32, #tpu.memory_space<vmem>>, vector<1x128x128xf32>
    %165 = vector.shape_cast %164 : vector<1x128x128xf32> to vector<128x128xf32>
    %cst_92 = arith.constant dense<0.000000e+00> : vector<8x128xf32>
    %166 = tpu.matmul %162, %165, %cst_92 {dimension_numbers = #tpu.dot_dimension_numbers<[1], [0], [0], [1], [0, 0, 1, 1], [], []>} : vector<8x128xf32>, vector<128x128xf32>, vector<8x128xf32> -> vector<8x128xf32>
    %167 = arith.addf %159, %166 : vector<8x128xf32>
    %c3_i32_93 = arith.constant 3 : i32
    %168 = arith.index_cast %c3_i32_93 : i32 to index
    %c0_94 = arith.constant 0 : index
    %c0_95 = arith.constant 0 : index
    %169 = vector.load %arg12[%168, %c0_94, %c0_95] : memref<8x8x128xf32, #tpu.memory_space<vmem>>, vector<1x8x128xf32>
    %170 = vector.shape_cast %169 : vector<1x8x128xf32> to vector<8x128xf32>
    %171 = arith.index_cast %c3_i32_93 : i32 to index
    %c0_96 = arith.constant 0 : index
    %c0_97 = arith.constant 0 : index
    %172 = vector.load %arg6[%171, %c0_96, %c0_97] : memref<8x128x128xf32, #tpu.memory_space<vmem>>, vector<1x128x128xf32>
    %173 = vector.shape_cast %172 : vector<1x128x128xf32> to vector<128x128xf32>
    %cst_98 = arith.constant dense<0.000000e+00> : vector<8x128xf32>
    %174 = tpu.matmul %170, %173, %cst_98 {dimension_numbers = #tpu.dot_dimension_numbers<[1], [0], [0], [1], [0, 0, 1, 1], [], []>} : vector<8x128xf32>, vector<128x128xf32>, vector<8x128xf32> -> vector<8x128xf32>
    %175 = arith.addf %167, %174 : vector<8x128xf32>
    %c4_i32_99 = arith.constant 4 : i32
    %176 = arith.index_cast %c4_i32_99 : i32 to index
    %c0_100 = arith.constant 0 : index
    %c0_101 = arith.constant 0 : index
    %177 = vector.load %arg12[%176, %c0_100, %c0_101] : memref<8x8x128xf32, #tpu.memory_space<vmem>>, vector<1x8x128xf32>
    %178 = vector.shape_cast %177 : vector<1x8x128xf32> to vector<8x128xf32>
    %179 = arith.index_cast %c4_i32_99 : i32 to index
    %c0_102 = arith.constant 0 : index
    %c0_103 = arith.constant 0 : index
    %180 = vector.load %arg6[%179, %c0_102, %c0_103] : memref<8x128x128xf32, #tpu.memory_space<vmem>>, vector<1x128x128xf32>
    %181 = vector.shape_cast %180 : vector<1x128x128xf32> to vector<128x128xf32>
    %cst_104 = arith.constant dense<0.000000e+00> : vector<8x128xf32>
    %182 = tpu.matmul %178, %181, %cst_104 {dimension_numbers = #tpu.dot_dimension_numbers<[1], [0], [0], [1], [0, 0, 1, 1], [], []>} : vector<8x128xf32>, vector<128x128xf32>, vector<8x128xf32> -> vector<8x128xf32>
    %183 = arith.addf %175, %182 : vector<8x128xf32>
    %c5_i32_105 = arith.constant 5 : i32
    %184 = arith.index_cast %c5_i32_105 : i32 to index
    %c0_106 = arith.constant 0 : index
    %c0_107 = arith.constant 0 : index
    %185 = vector.load %arg12[%184, %c0_106, %c0_107] : memref<8x8x128xf32, #tpu.memory_space<vmem>>, vector<1x8x128xf32>
    %186 = vector.shape_cast %185 : vector<1x8x128xf32> to vector<8x128xf32>
    %187 = arith.index_cast %c5_i32_105 : i32 to index
    %c0_108 = arith.constant 0 : index
    %c0_109 = arith.constant 0 : index
    %188 = vector.load %arg6[%187, %c0_108, %c0_109] : memref<8x128x128xf32, #tpu.memory_space<vmem>>, vector<1x128x128xf32>
    %189 = vector.shape_cast %188 : vector<1x128x128xf32> to vector<128x128xf32>
    %cst_110 = arith.constant dense<0.000000e+00> : vector<8x128xf32>
    %190 = tpu.matmul %186, %189, %cst_110 {dimension_numbers = #tpu.dot_dimension_numbers<[1], [0], [0], [1], [0, 0, 1, 1], [], []>} : vector<8x128xf32>, vector<128x128xf32>, vector<8x128xf32> -> vector<8x128xf32>
    %191 = arith.addf %183, %190 : vector<8x128xf32>
    %c6_i32_111 = arith.constant 6 : i32
    %192 = arith.index_cast %c6_i32_111 : i32 to index
    %c0_112 = arith.constant 0 : index
    %c0_113 = arith.constant 0 : index
    %193 = vector.load %arg12[%192, %c0_112, %c0_113] : memref<8x8x128xf32, #tpu.memory_space<vmem>>, vector<1x8x128xf32>
    %194 = vector.shape_cast %193 : vector<1x8x128xf32> to vector<8x128xf32>
    %195 = arith.index_cast %c6_i32_111 : i32 to index
    %c0_114 = arith.constant 0 : index
    %c0_115 = arith.constant 0 : index
    %196 = vector.load %arg6[%195, %c0_114, %c0_115] : memref<8x128x128xf32, #tpu.memory_space<vmem>>, vector<1x128x128xf32>
    %197 = vector.shape_cast %196 : vector<1x128x128xf32> to vector<128x128xf32>
    %cst_116 = arith.constant dense<0.000000e+00> : vector<8x128xf32>
    %198 = tpu.matmul %194, %197, %cst_116 {dimension_numbers = #tpu.dot_dimension_numbers<[1], [0], [0], [1], [0, 0, 1, 1], [], []>} : vector<8x128xf32>, vector<128x128xf32>, vector<8x128xf32> -> vector<8x128xf32>
    %199 = arith.addf %191, %198 : vector<8x128xf32>
    %c7_i32_117 = arith.constant 7 : i32
    %200 = arith.index_cast %c7_i32_117 : i32 to index
    %c0_118 = arith.constant 0 : index
    %c0_119 = arith.constant 0 : index
    %201 = vector.load %arg12[%200, %c0_118, %c0_119] : memref<8x8x128xf32, #tpu.memory_space<vmem>>, vector<1x8x128xf32>
    %202 = vector.shape_cast %201 : vector<1x8x128xf32> to vector<8x128xf32>
    %203 = arith.index_cast %c7_i32_117 : i32 to index
    %c0_120 = arith.constant 0 : index
    %c0_121 = arith.constant 0 : index
    %204 = vector.load %arg6[%203, %c0_120, %c0_121] : memref<8x128x128xf32, #tpu.memory_space<vmem>>, vector<1x128x128xf32>
    %205 = vector.shape_cast %204 : vector<1x128x128xf32> to vector<128x128xf32>
    %cst_122 = arith.constant dense<0.000000e+00> : vector<8x128xf32>
    %206 = tpu.matmul %202, %205, %cst_122 {dimension_numbers = #tpu.dot_dimension_numbers<[1], [0], [0], [1], [0, 0, 1, 1], [], []>} : vector<8x128xf32>, vector<128x128xf32>, vector<8x128xf32> -> vector<8x128xf32>
    %207 = arith.addf %199, %206 : vector<8x128xf32>
    %c8_i32_123 = arith.constant 8 : i32
    %c0_124 = arith.constant 0 : index
    %c0_125 = arith.constant 0 : index
    %208 = vector.load %arg9[%c0_124, %c0_125] : memref<1x128xf32, #tpu.memory_space<vmem>>, vector<1x128xf32>
    %209 = vector.broadcast %208 : vector<1x128xf32> to vector<8x128xf32>
    %210 = arith.addf %207, %209 : vector<8x128xf32>
    %c0_126 = arith.constant 0 : index
    %c0_127 = arith.constant 0 : index
    %211 = vector.load %arg10[%c0_126, %c0_127] : memref<8x128xf32, #tpu.memory_space<vmem>>, vector<8x128xf32>
    tpu.vector_store %arg10[%c0_126, %c0_127], %210 {strides = array<i32>} : memref<8x128xf32, #tpu.memory_space<vmem>>, vector<8x128xf32>,
    return
  }
  func.func @transform_0(%arg0: i32) -> (i32, i32, i32) {
    %c0_i32 = arith.constant 0 : i32
    %c0_i32_0 = arith.constant 0 : i32
    %c0_i32_1 = arith.constant 0 : i32
    return %c0_i32, %arg0, %c0_i32_0 : i32, i32, i32
  }
  func.func @transform_1(%arg0: i32) -> (i32, i32) {
    %c0_i32 = arith.constant 0 : i32
    %c0_i32_0 = arith.constant 0 : i32
    %c0_i32_1 = arith.constant 0 : i32
    return %c0_i32, %c0_i32_0 : i32, i32
  }
  func.func @transform_2(%arg0: i32) -> (i32, i32) {
    %c0_i32 = arith.constant 0 : i32
    %c0_i32_0 = arith.constant 0 : i32
    %c0_i32_1 = arith.constant 0 : i32
    return %c0_i32, %c0_i32_0 : i32, i32
  }
  func.func @transform_3(%arg0: i32) -> (i32, i32) {
    %c0_i32 = arith.constant 0 : i32
    %c0_i32_0 = arith.constant 0 : i32
    %c0_i32_1 = arith.constant 0 : i32
    return %c0_i32, %c0_i32_0 : i32, i32
  }
  func.func @transform_4(%arg0: i32) -> (i32, i32) {
    %c0_i32 = arith.constant 0 : i32
    %c0_i32_0 = arith.constant 0 : i32
    %c0_i32_1 = arith.constant 0 : i32
    return %c0_i32, %c0_i32_0 : i32, i32
  }
  func.func @transform_5(%arg0: i32) -> (i32, i32, i32) {
    %c0_i32 = arith.constant 0 : i32
    %c0_i32_0 = arith.constant 0 : i32
    %c0_i32_1 = arith.constant 0 : i32
    %c0_i32_2 = arith.constant 0 : i32
    return %c0_i32, %c0_i32_0, %c0_i32_1 : i32, i32, i32
  }
  func.func @transform_6(%arg0: i32) -> (i32, i32) {
    %c0_i32 = arith.constant 0 : i32
    %c0_i32_0 = arith.constant 0 : i32
    %c0_i32_1 = arith.constant 0 : i32
    return %c0_i32, %c0_i32_0 : i32, i32
  }
  func.func @transform_7(%arg0: i32) -> (i32, i32) {
    %c0_i32 = arith.constant 0 : i32
    %c0_i32_0 = arith.constant 0 : i32
    %c0_i32_1 = arith.constant 0 : i32
    return %c0_i32, %c0_i32_0 : i32, i32
  }
  func.func @transform_8(%arg0: i32) -> (i32, i32) {
    %c0_i32 = arith.constant 0 : i32
    %c0_i32_0 = arith.constant 0 : i32
    %c0_i32_1 = arith.constant 0 : i32
    return %c0_i32, %c0_i32_0 : i32, i32
  }
  func.func @transform_9(%arg0: i32) -> (i32, i32) {
    %c0_i32 = arith.constant 0 : i32
    %c0_i32_0 = arith.constant 0 : i32
    return %arg0, %c0_i32 : i32, i32
  }
}

</mosaic_0001>

<bundles_post_ra>
// kernel: rnn_forward_pallas.1
= control target key start
LH: loop header
LB: loop body
LE: loop exit
PB: predicated region body
PF: predicated region fallthrough
CT: control target
= control target key end

     0   :  { %14 = vsyncpa [#allocation5], 0  ;;  %s1934_s0 = inlined_call_operand.vmem [shape: f32[8,8,28], index: 0, kind: input, shape index: {}]   ;;  %s1935_s1 = inlined_call_operand.vmem [shape: f32[28,128], index: 1, kind: input, shape index: {}]   ;;  %s1936_s2 = inlined_call_operand.hbm [shape: f32[128,128], index: 2, kind: input, shape index: {}]   ;;  %s1937_s3 = inlined_call_operand.hbm [shape: f32[128,128], index: 3, kind: input, shape index: {}]   ;;  %s1938_s4 = inlined_call_operand.hbm [shape: f32[128,128], index: 4, kind: input, shape index: {}]   ;;  %s1939_s5 = inlined_call_operand.hbm [shape: f32[8,128,128], index: 5, kind: input, shape index: {}]   ;;  %s1940_s6 = inlined_call_operand.vmem [shape: f32[1,128], index: 6, kind: input, shape index: {}]   ;;  %s1941_s7 = inlined_call_operand.vmem [shape: f32[1,128], index: 7, kind: input, shape index: {}]   ;;  %s1942_s8 = inlined_call_operand.vmem [shape: f32[1,128], index: 8, kind: input, shape index: {}]   ;;  %s1943_s9 = inlined_call_operand.vmem [shape: f32[8,128], index: 9, kind: output, shape index: {}]  }
   0x1   :  { %15 = vsyncpa [#allocation7], 0 }
   0x2   :  { %16 = vsyncpa [#allocation10], 0  ;;  %s38_s11 = sshll.u32 %s1937_s3, 4  ;;  %s1268_s12 = smov [#allocation6]   ;;  %s39_s11 = int_to_ptr.hbm [resolvable:$true] %s38_s11 }
   0x3   :  { %s40_s13 = sshll.u32 %s1268_s12, 4  ;;  %s25_s16 = sshll.u32 %s1936_s2, 4  ;;  %s41_s13 = int_to_ptr.vmem [resolvable:$true] %s40_s13  ;;  %s26_s16 = int_to_ptr.hbm [resolvable:$true] %s25_s16 }
   0x4   :  { %s1269_s17 = smov 128   ;;  %s1270_s18 = smov 8  }
   0x5   :  { %46 = dma.hbm_to_vmem [thread:$0]  %s39_s11, 2048, %s41_s13, [#allocation7], %s1269_s17, %s1269_s17, %s1270_s18  }
   0x6   :  { %s1271_s19 = smov [#allocation4]   ;;  %s51_s23 = sshll.u32 %s1938_s4, 4  ;;  %s52_s23 = int_to_ptr.hbm [resolvable:$true] %s51_s23 }
   0x7   :  { %s27_s20 = sshll.u32 %s1271_s19, 4  ;;  %s64_s25 = sshll.u32 %s1939_s5, 4  ;;  %s28_s20 = int_to_ptr.vmem [resolvable:$true] %s27_s20  ;;  %s65_s25 = int_to_ptr.hbm [resolvable:$true] %s64_s25 }
   0x8   :  { %33 = dma.hbm_to_vmem [thread:$0]  %s26_s16, 2048, %s28_s20, [#allocation5], %s1269_s17, %s1269_s17, %s1270_s18  }
   0x9   :  { %s1272_s26 = smov [#allocation8]   ;;  %s1273_s2 = smov [#allocation9]  }
   0xa   :  { %s53_s27 = sshll.u32 %s1272_s26, 4  ;;  %s66_s28 = sshll.u32 %s1273_s2, 4  ;;  %s54_s27 = int_to_ptr.vmem [resolvable:$true] %s53_s27  ;;  %s67_s28 = int_to_ptr.vmem [resolvable:$true] %s66_s28 }
   0xb   :  { %59 = dma.hbm_to_vmem [thread:$0]  %s52_s23, 2048, %s54_s27, [#allocation7], %s1269_s17, %s1269_s17, %s1270_s18  }
   0xc   :  { %72 = dma.hbm_to_vmem [thread:$0]  %s65_s25, 16384, %s67_s28, [#allocation10], %s1269_s17, %s1269_s17, %s1270_s18  }
   0xd   :  { %1262 = dma.done.wait [#allocation5], 2048  }
   0xe   :  { %1263 = vsyncadd [#allocation5], 4294965248 }
   0xf   :  { %1264 = dma.done.wait [#allocation7], 4096  }
  0x10   :  { %1265 = vsyncadd [#allocation7], 4294963200 }
  0x11   :  { %1266 = dma.done.wait [#allocation10], 16384  }
  0x12   :  { %1267 = vsyncadd [#allocation10], 4294950912  ;;  %v1337_v0 = vld [vmem:[#allocation4 + $0x78] sm:$0xff]  ;;  %v1339_v1 = vld [vmem:[#allocation4 + $0x70] sm:$0xff]  ;;  %vm132_vm0 = vcmask 1043456   ;;  %vm107_vm1 = vcmask 228352  }
  0x13   :  { %247 = vmatpush.msra.mxu1 %v1337_v0  ;;  %v1342_v2 = vld [vmem:[#allocation4 + $0x68] sm:$0xff]  ;;  %v106_v3 = vld [vmem:[%s1935_s1 + $0x18] sm:$0xf]  ;;  %v1348_v4 = vld [vmem:[#allocation4 + $0x60] sm:$0xff]  ;;  %v1274_v41 = vmov 0.0  }
  0x14   :  { %1113 = vmatpush.msk.msra.mxu0 %vm132_vm0, %v106_v3  ;;  %v105_v5 = vld [vmem:[%s1935_s1 + $0x10] sm:$0xff]  ;;  %v104_v6 = vld [vmem:[%s1935_s1 + $0x8] sm:$0xff]  ;;  %v1357_v7 = vld [vmem:[#allocation4 + $0x58] sm:$0xff] }
  0x15   :  { %248 = vmatpush.msra.mxu1 %v1339_v1  ;;  %v103_v8 = vld [vmem:[%s1935_s1] sm:$0xff]  ;;  %v1363_v9 = vld [vmem:[#allocation8 + $0x78] sm:$0xff]  ;;  %v1367_v11 = vld [vmem:[#allocation8 + $0x70] sm:$0xff] }
  0x16   :  { %149 = vmatpush.msra.mxu0 %v105_v5  ;;  %v1365_v10 = vld [vmem:[#allocation6 + $0x78] sm:$0xff]  ;;  %v1369_v12 = vld [vmem:[#allocation4 + $0x50] sm:$0xff]  ;;  %v95_v13 = vld [vmem:[%s1934_s0] sm:$0xff]  ;;  %269 = vmatpush.msra.mxu2 %v1363_v9 }
  0x17   :  { %249 = vmatpush.msra.mxu1 %v1342_v2  ;;  %289 = vmatpush.msra.mxu3 %v1365_v10  ;;  %v1377_v14 = vld [vmem:[#allocation6 + $0x70] sm:$0xff]  ;;  %v1379_v15 = vld [vmem:[#allocation8 + $0x68] sm:$0xff]  ;;  %v1388_v18 = vld [vmem:[#allocation8 + $0x60] sm:$0xff] }
  0x18   :  { %150 = vmatpush.msra.mxu0 %v104_v6  ;;  %v1381_v16 = vld [vmem:[#allocation4 + $0x48] sm:$0xff]  ;;  %270 = vmatpush.msra.mxu2 %v1367_v11  ;;  %v1390_v19 = vld [vmem:[#allocation4 + $0x40] sm:$0xff]  ;;  %v1397_v21 = vld [vmem:[#allocation8 + $0x58] sm:$0xff] }
  0x19   :  { %250 = vmatpush.msra.mxu1 %v1348_v4  ;;  %v1386_v17 = vld [vmem:[#allocation6 + $0x68] sm:$0xff]  ;;  %290 = vmatpush.msra.mxu3 %v1377_v14  ;;  %v1395_v20 = vld [vmem:[#allocation6 + $0x60] sm:$0xff]  ;;  %v1400_v22 = vld [vmem:[#allocation4 + $0x38] sm:$0xff] }
  0x1a   :  { %151 = vmatpush.msra.mxu0 %v103_v8  ;;  %271 = vmatpush.msra.mxu2 %v1379_v15  ;;  %v1405_v23 = vld [vmem:[#allocation6 + $0x58] sm:$0xff]  ;;  %v1407_v24 = vld [vmem:[#allocation8 + $0x50] sm:$0xff]  ;;  %v1417_v27 = vld [vmem:[#allocation8 + $0x48] sm:$0xff] }
  0x1b   :  { %251 = vmatpush.msra.mxu1 %v1357_v7  ;;  %1114 = vmatmul.msk.f32.vlgmr.msra.gmra.mxu0 %vm107_vm1, %v95_v13  ;;  %v1410_v25 = vld [vmem:[#allocation4 + $0x30] sm:$0xff]  ;;  %v1420_v28 = vld [vmem:[#allocation4 + $0x28] sm:$0xff]  ;;  %v1427_v30 = vld [vmem:[#allocation8 + $0x40] sm:$0xff] }
  0x1c   :  { %385 = vmatpush.msrb.mxu0 %v1337_v0  ;;  %291 = vmatpush.msra.mxu3 %v1386_v17  ;;  %v1415_v26 = vld [vmem:[#allocation6 + $0x50] sm:$0xff]  ;;  %v1425_v29 = vld [vmem:[#allocation6 + $0x48] sm:$0xff]  ;;  %v1430_v31 = vld [vmem:[#allocation4 + $0x20] sm:$0xff] }
  0x1d   :  { %252 = vmatpush.msra.mxu1 %v1369_v12  ;;  %272 = vmatpush.msra.mxu2 %v1388_v18  ;;  %v1435_v32 = vld [vmem:[#allocation6 + $0x40] sm:$0xff]  ;;  %v1437_v33 = vld [vmem:[#allocation8 + $0x38] sm:$0xff]  ;;  %v1447_v36 = vld [vmem:[#allocation8 + $0x30] sm:$0xff] }
  0x1e   :  { %386 = vmatpush.msrb.mxu0 %v1339_v1  ;;  %292 = vmatpush.msra.mxu3 %v1395_v20  ;;  %v1440_v34 = vld [vmem:[#allocation4 + $0x18] sm:$0xff]  ;;  %v1450_v37 = vld [vmem:[#allocation4 + $0x10] sm:$0xff]  ;;  %v1458_v39 = vld [vmem:[#allocation4 + $0x8] sm:$0xff] }
  0x1f   :  { %253 = vmatpush.msra.mxu1 %v1381_v16  ;;  %273 = vmatpush.msra.mxu2 %v1397_v21  ;;  %v1445_v35 = vld [vmem:[#allocation6 + $0x38] sm:$0xff]  ;;  %v1455_v38 = vld [vmem:[#allocation6 + $0x30] sm:$0xff]  ;;  %v1464_v40 = vld [vmem:[#allocation4] sm:$0xff] }
  0x20   :  { %387 = vmatpush.msrb.mxu0 %v1342_v2  ;;  %293 = vmatpush.msra.mxu3 %v1405_v23  ;;  %v1514_v42 = vld [vmem:[#allocation8 + $0x28] sm:$0xff]  ;;  %v1522_v44 = vld [vmem:[#allocation8 + $0x20] sm:$0xff]  ;;  %v1528_v46 = vld [vmem:[#allocation8 + $0x18] sm:$0xff] }
  0x21   :  { %254 = vmatpush.msra.mxu1 %v1390_v19  ;;  %274 = vmatpush.msra.mxu2 %v1407_v24  ;;  %v1516_v43 = vld [vmem:[#allocation6 + $0x28] sm:$0xff]  ;;  %v1524_v45 = vld [vmem:[#allocation6 + $0x20] sm:$0xff]  ;;  %v1530_v47 = vld [vmem:[#allocation6 + $0x18] sm:$0xff] }
  0x22   :  { %388 = vmatpush.msrb.mxu0 %v1348_v4  ;;  %294 = vmatpush.msra.mxu3 %v1415_v26  ;;  %v1536_v48 = vld [vmem:[#allocation8 + $0x10] sm:$0xff]  ;;  %v1540_v50 = vld [vmem:[#allocation8 + $0x8] sm:$0xff]  ;;  %v1552_v53 = vld [vmem:[#allocation8] sm:$0xff] }
  0x23   :  { %255 = vmatpush.msra.mxu1 %v1400_v22  ;;  %275 = vmatpush.msra.mxu2 %v1417_v27  ;;  %v1538_v49 = vld [vmem:[#allocation6 + $0x10] sm:$0xff]  ;;  %v1542_v51 = vld [vmem:[#allocation6 + $0x8] sm:$0xff]  ;;  %v1554_v54 = vld [vmem:[#allocation6] sm:$0xff] }
  0x24   :  { %389 = vmatpush.msrb.mxu0 %v1357_v7  ;;  %295 = vmatpush.msra.mxu3 %v1425_v29  ;;  %v96_v52 = vld [vmem:[%s1934_s0 + $0x8] sm:$0xff]  ;;  %v97_v55 = vld [vmem:[%s1934_s0 + $0x10] sm:$0xff]  ;;  %v98_v56 = vld [vmem:[%s1934_s0 + $0x18] sm:$0xff] }
  0x25   :  { %256 = vmatpush.msra.mxu1 %v1410_v25  ;;  %276 = vmatpush.msra.mxu2 %v1427_v30  ;;  %v1593_v57 = vld [vmem:[%s1940_s6] ss:$0 sm:$0xff]  ;;  %v100_v63 = vld [vmem:[%s1934_s0 + $0x28] sm:$0xff]  ;;  %v101_v5 = vld [vmem:[%s1934_s0 + $0x30] sm:$0xff] }
  0x26   :  { %390 = vmatpush.msrb.mxu0 %v1369_v12  ;;  %296 = vmatpush.msra.mxu3 %v1435_v32  ;;  %v99_v59 = vld [vmem:[%s1934_s0 + $0x20] sm:$0xff]  ;;  %v102_v6 = vld [vmem:[%s1934_s0 + $0x38] sm:$0xff] }
  0x27   :  { %257 = vmatpush.msra.mxu1 %v1420_v28  ;;  %277 = vmatpush.msra.mxu2 %v1437_v33 }
  0x28   :  { %391 = vmatpush.msrb.mxu0 %v1381_v16  ;;  %297 = vmatpush.msra.mxu3 %v1445_v35 }
  0x29   :  { %258 = vmatpush.msra.mxu1 %v1430_v31  ;;  %278 = vmatpush.msra.mxu2 %v1447_v36 }
  0x2a   :  { %392 = vmatpush.msrb.mxu0 %v1390_v19  ;;  %298 = vmatpush.msra.mxu3 %v1455_v38 }
  0x2b   :  { %259 = vmatpush.msra.mxu1 %v1440_v34  ;;  %279 = vmatpush.msra.mxu2 %v1514_v42 }
  0x2c   :  { %393 = vmatpush.msrb.mxu0 %v1400_v22  ;;  %299 = vmatpush.msra.mxu3 %v1516_v43 }
  0x2d   :  { %260 = vmatpush.msra.mxu1 %v1450_v37  ;;  %280 = vmatpush.msra.mxu2 %v1522_v44 }
  0x2e   :  { %394 = vmatpush.msrb.mxu0 %v1410_v25  ;;  %300 = vmatpush.msra.mxu3 %v1524_v45 }
  0x2f   :  { %261 = vmatpush.msra.mxu1 %v1458_v39  ;;  %281 = vmatpush.msra.mxu2 %v1528_v46 }
  0x30   :  { %395 = vmatpush.msrb.mxu0 %v1420_v28  ;;  %301 = vmatpush.msra.mxu3 %v1530_v47 }
  0x31   :  { %262 = vmatpush.msra.mxu1 %v1464_v40  ;;  %282 = vmatpush.msra.mxu2 %v1536_v48 }
  0x32   :  { %263 = vmatmul.f32.vlgmr.msra.gmra.mxu1 %v1274_v41  ;;  %396 = vmatpush.msrb.mxu0 %v1430_v31 }
  0x33   :  { %317 = vmatpush.msrb.mxu1 %v1337_v0  ;;  %302 = vmatpush.msra.mxu3 %v1538_v49 }
  0x34   :  { %397 = vmatpush.msrb.mxu0 %v1440_v34  ;;  %283 = vmatpush.msra.mxu2 %v1540_v50 }
  0x35   :  { %318 = vmatpush.msrb.mxu1 %v1339_v1  ;;  %1115 = vmatmul.msk.f32.gmra.mxu0 %vm107_vm1, %v96_v52 }
  0x36   :  { %398 = vmatpush.msrb.mxu0 %v1450_v37  ;;  %303 = vmatpush.msra.mxu3 %v1542_v51 }
  0x37   :  { %319 = vmatpush.msrb.mxu1 %v1342_v2  ;;  %284 = vmatpush.msra.mxu2 %v1552_v53 }
  0x38   :  { %399 = vmatpush.msrb.mxu0 %v1458_v39  ;;  %304 = vmatpush.msra.mxu3 %v1554_v54 }
  0x39   :  { %320 = vmatpush.msrb.mxu1 %v1348_v4  ;;  %285 = vmatmul.f32.vlgmr.msra.gmra.mxu2 %v1274_v41 }
  0x3a   :  { %400 = vmatpush.msrb.mxu0 %v1464_v40  ;;  %359 = vmatpush.msrb.mxu3 %v1365_v10 }
  0x3b   :  { %321 = vmatpush.msrb.mxu1 %v1357_v7  ;;  %339 = vmatpush.msrb.mxu2 %v1363_v9 }
  0x3c   :  { %475 = vmatpush.msra.mxu0 %v1363_v9  ;;  %360 = vmatpush.msrb.mxu3 %v1377_v14 }
  0x3d   :  { %322 = vmatpush.msrb.mxu1 %v1369_v12  ;;  %340 = vmatpush.msrb.mxu2 %v1367_v11 }
  0x3e   :  { %476 = vmatpush.msra.mxu0 %v1367_v11  ;;  %361 = vmatpush.msrb.mxu3 %v1386_v17 }
  0x3f   :  { %323 = vmatpush.msrb.mxu1 %v1381_v16  ;;  %1116 = vmatmul.msk.f32.gmra.mxu0 %vm107_vm1, %v97_v55 }
  0x40   :  { %477 = vmatpush.msra.mxu0 %v1379_v15  ;;  %341 = vmatpush.msrb.mxu2 %v1379_v15 }
  0x41   :  { %324 = vmatpush.msrb.mxu1 %v1390_v19  ;;  %362 = vmatpush.msrb.mxu3 %v1395_v20 }
  0x42   :  { %478 = vmatpush.msra.mxu0 %v1388_v18  ;;  %342 = vmatpush.msrb.mxu2 %v1388_v18 }
  0x43   :  { %325 = vmatpush.msrb.mxu1 %v1400_v22  ;;  %363 = vmatpush.msrb.mxu3 %v1405_v23 }
  0x44   :  { %479 = vmatpush.msra.mxu0 %v1397_v21  ;;  %343 = vmatpush.msrb.mxu2 %v1397_v21 }
  0x45   :  { %326 = vmatpush.msrb.mxu1 %v1410_v25  ;;  %364 = vmatpush.msrb.mxu3 %v1415_v26 }
  0x46   :  { %480 = vmatpush.msra.mxu0 %v1407_v24  ;;  %344 = vmatpush.msrb.mxu2 %v1407_v24 }
  0x47   :  { %327 = vmatpush.msrb.mxu1 %v1420_v28  ;;  %1117 = vmatmul.msk.f32.gmra.mxu0 %vm107_vm1, %v98_v56  ;;  %v1681_v56 = vld [vmem:[%s1941_s7] ss:$0 sm:$0xff] }
  0x48   :  { %481 = vmatpush.msra.mxu0 %v1417_v27  ;;  %365 = vmatpush.msrb.mxu3 %v1425_v29 }
  0x49   :  { %328 = vmatpush.msrb.mxu1 %v1430_v31  ;;  %345 = vmatpush.msrb.mxu2 %v1417_v27 }
  0x4a   :  { %482 = vmatpush.msra.mxu0 %v1427_v30  ;;  %366 = vmatpush.msrb.mxu3 %v1435_v32 }
  0x4b   :  { %329 = vmatpush.msrb.mxu1 %v1440_v34  ;;  %346 = vmatpush.msrb.mxu2 %v1427_v30 }
  0x4c   :  { %483 = vmatpush.msra.mxu0 %v1437_v33  ;;  %367 = vmatpush.msrb.mxu3 %v1445_v35 }
  0x4d   :  { %330 = vmatpush.msrb.mxu1 %v1450_v37  ;;  %347 = vmatpush.msrb.mxu2 %v1437_v33 }
  0x4e   :  { %484 = vmatpush.msra.mxu0 %v1447_v36  ;;  %368 = vmatpush.msrb.mxu3 %v1455_v38 }
  0x4f   :  { %331 = vmatpush.msrb.mxu1 %v1458_v39  ;;  %348 = vmatpush.msrb.mxu2 %v1447_v36 }
  0x50   :  { %485 = vmatpush.msra.mxu0 %v1514_v42  ;;  %369 = vmatpush.msrb.mxu3 %v1516_v43 }
  0x51   :  { %332 = vmatpush.msrb.mxu1 %v1464_v40  ;;  %1118 = vmatmul.msk.f32.gmra.mxu0 %vm107_vm1, %v99_v59 }
  0x52   :  { %486 = vmatpush.msra.mxu0 %v1522_v44  ;;  %349 = vmatpush.msrb.mxu2 %v1514_v42 }
  0x53   :  { %407 = vmatpush.msra.mxu1 %v1363_v9  ;;  %370 = vmatpush.msrb.mxu3 %v1524_v45 }
  0x54   :  { %487 = vmatpush.msra.mxu0 %v1528_v46  ;;  %350 = vmatpush.msrb.mxu2 %v1522_v44 }
  0x55   :  { %408 = vmatpush.msra.mxu1 %v1367_v11  ;;  %371 = vmatpush.msrb.mxu3 %v1530_v47 }
  0x56   :  { %488 = vmatpush.msra.mxu0 %v1536_v48  ;;  %351 = vmatpush.msrb.mxu2 %v1528_v46 }
  0x57   :  { %409 = vmatpush.msra.mxu1 %v1379_v15  ;;  %372 = vmatpush.msrb.mxu3 %v1538_v49 }
  0x58   :  { %489 = vmatpush.msra.mxu0 %v1540_v50  ;;  %352 = vmatpush.msrb.mxu2 %v1536_v48 }
  0x59   :  { %410 = vmatpush.msra.mxu1 %v1388_v18  ;;  %1119 = vmatmul.msk.f32.gmra.mxu0 %vm107_vm1, %v100_v63 }
  0x5a   :  { %490 = vmatpush.msra.mxu0 %v1552_v53  ;;  %373 = vmatpush.msrb.mxu3 %v1542_v51 }
  0x5b   :  { %411 = vmatpush.msra.mxu1 %v1397_v21  ;;  %353 = vmatpush.msrb.mxu2 %v1540_v50 }
  0x5c   :  { %374 = vmatpush.msrb.mxu3 %v1554_v54 }
  0x5d   :  { %412 = vmatpush.msra.mxu1 %v1407_v24  ;;  %354 = vmatpush.msrb.mxu2 %v1552_v53 }
  0x5f   :  { %413 = vmatpush.msra.mxu1 %v1417_v27  ;;  %427 = vmatpush.msra.mxu2 %v1365_v10 }
  0x61   :  { %414 = vmatpush.msra.mxu1 %v1427_v30  ;;  %428 = vmatpush.msra.mxu2 %v1377_v14 }
  0x62   :  { %1120 = vmatmul.msk.f32.gmra.mxu0 %vm107_vm1, %v101_v5 }
  0x63   :  { %415 = vmatpush.msra.mxu1 %v1437_v33  ;;  %429 = vmatpush.msra.mxu2 %v1386_v17 }
  0x65   :  { %416 = vmatpush.msra.mxu1 %v1447_v36  ;;  %430 = vmatpush.msra.mxu2 %v1395_v20 }
  0x67   :  { %417 = vmatpush.msra.mxu1 %v1514_v42  ;;  %431 = vmatpush.msra.mxu2 %v1405_v23 }
  0x69   :  { %418 = vmatpush.msra.mxu1 %v1522_v44  ;;  %432 = vmatpush.msra.mxu2 %v1415_v26 }
  0x6a   :  { %1121 = vmatmul.msk.f32.gmra.mxu0 %vm107_vm1, %v102_v6 }
  0x6b   :  { %419 = vmatpush.msra.mxu1 %v1528_v46  ;;  %433 = vmatpush.msra.mxu2 %v1425_v29 }
  0x6d   :  { %420 = vmatpush.msra.mxu1 %v1536_v48  ;;  %434 = vmatpush.msra.mxu2 %v1435_v32 }
  0x6f   :  { %421 = vmatpush.msra.mxu1 %v1540_v50  ;;  %435 = vmatpush.msra.mxu2 %v1445_v35 }
  0x71   :  { %422 = vmatpush.msra.mxu1 %v1552_v53  ;;  %436 = vmatpush.msra.mxu2 %v1455_v38 }
  0x73   :  { %437 = vmatpush.msra.mxu2 %v1516_v43 }
  0x75   :  { %438 = vmatpush.msra.mxu2 %v1524_v45 }
  0x77   :  { %439 = vmatpush.msra.mxu2 %v1530_v47 }
  0x79   :  { %440 = vmatpush.msra.mxu2 %v1538_v49 }
  0x7b   :  { %441 = vmatpush.msra.mxu2 %v1542_v51 }
  0x7d   :  { %442 = vmatpush.msra.mxu2 %v1554_v54 }
  0x98   :  { %v153_v58 = vpop.f32.mrf.mxu0 }
  0x99   :  { %v181_v60 = vadd.f32 %v1593_v57, %v153_v58 }
  0xaf   :  { %v264_v61 = vpop.f32.mrf.mxu1 }
  0xb0   :  { %v267_v62 = vadd.f32 %v264_v61, %v181_v60 }
  0xb2   :  { %1132 = vtanh.f32 %v267_v62  ;;  %v156_v8 = vpop.f32.mrf.mxu0 }
  0xb3   :  { %v182_v13 = vadd.f32 %v1593_v57, %v156_v8 }
  0xb8   :  { %v1133_v3 = vpop.eup %1132 }
  0xb9   :  { %305 = vmatmul.f32.vlgmr.msra.gmra.mxu3 %v1133_v3  ;;  %333 = vmatmul.f32.vlgmr.msrb.gmra.mxu1 %v1133_v3 }
  0xba   :  { %453 = vmatpush.msra.mxu3 %v1337_v0  ;;  %495 = vmatpush.msrb.mxu1 %v1365_v10 }
  0xbc   :  { %454 = vmatpush.msra.mxu3 %v1339_v1  ;;  %496 = vmatpush.msrb.mxu1 %v1377_v14  ;;  %v286_v55 = vpop.f32.mrf.mxu2  ;;  %v159_v63 = vpop.f32.mrf.mxu0 }
  0xbe   :  { %455 = vmatpush.msra.mxu3 %v1342_v2  ;;  %497 = vmatpush.msrb.mxu1 %v1386_v17 }
  0xc0   :  { %456 = vmatpush.msra.mxu3 %v1348_v4  ;;  %498 = vmatpush.msrb.mxu1 %v1395_v20 }
  0xc2   :  { %457 = vmatpush.msra.mxu3 %v1357_v7  ;;  %499 = vmatpush.msrb.mxu1 %v1405_v23 }
  0xc4   :  { %458 = vmatpush.msra.mxu3 %v1369_v12  ;;  %500 = vmatpush.msrb.mxu1 %v1415_v26  ;;  %v1735_v3 = vpop.f32.mrf.mxu0 }
  0xc6   :  { %459 = vmatpush.msra.mxu3 %v1381_v16  ;;  %501 = vmatpush.msrb.mxu1 %v1425_v29 }
  0xc8   :  { %460 = vmatpush.msra.mxu3 %v1390_v19  ;;  %502 = vmatpush.msrb.mxu1 %v1435_v32 }
  0xca   :  { %461 = vmatpush.msra.mxu3 %v1400_v22  ;;  %503 = vmatpush.msrb.mxu1 %v1445_v35 }
  0xcc   :  { %462 = vmatpush.msra.mxu3 %v1410_v25  ;;  %504 = vmatpush.msrb.mxu1 %v1455_v38 }
  0xce   :  { %463 = vmatpush.msra.mxu3 %v1420_v28  ;;  %505 = vmatpush.msrb.mxu1 %v1516_v43  ;;  %v1737_v5 = vpop.f32.mrf.mxu0 }
  0xd0   :  { %464 = vmatpush.msra.mxu3 %v1430_v31  ;;  %506 = vmatpush.msrb.mxu1 %v1524_v45 }
  0xd2   :  { %465 = vmatpush.msra.mxu3 %v1440_v34  ;;  %507 = vmatpush.msrb.mxu1 %v1530_v47 }
  0xd4   :  { %466 = vmatpush.msra.mxu3 %v1450_v37  ;;  %508 = vmatpush.msrb.mxu1 %v1538_v49 }
  0xd6   :  { %467 = vmatpush.msra.mxu3 %v1458_v39  ;;  %509 = vmatpush.msrb.mxu1 %v1542_v51  ;;  %v1739_v6 = vpop.f32.mrf.mxu0 }
  0xd8   :  { %468 = vmatpush.msra.mxu3 %v1464_v40  ;;  %510 = vmatpush.msrb.mxu1 %v1554_v54 }
  0xdf   :  { %v1741_v8 = vpop.f32.mrf.mxu0 }
 0x136   :  { %v334_v41 = vpop.f32.mrf.mxu1 }
 0x137   :  { %v337_v52 = vadd.f32 %v334_v41, %v182_v13  ;;  %v1743_v13 = vpop.f32.mrf.mxu0  ;;  %v183_v41 = vadd.f32 %v1593_v57, %v159_v63 }
 0x138   :  { %1944 = vst [vmem:[#allocation14_spill] sm:$0xff] %v1743_v13 }
 0x139   :  { %1134 = vtanh.f32 %v337_v52 }
 0x13c   :  { %v306_v58 = vpop.f32.mrf.mxu3 }
 0x13d   :  { %v307_v59 = vadd.f32 %v306_v58, %v286_v55 }
 0x13f   :  { %v1135_v60 = vpop.eup %1134  ;;  %v312_v61 = vadd.f32 %v1681_v56, %v307_v59 }
 0x140   :  { %375 = vmatmul.f32.vlgmr.msrb.gmra.mxu3 %v1135_v60  ;;  %401 = vmatmul.f32.vlgmr.msrb.gmra.mxu0 %v1135_v60 }
 0x141   :  { %1136 = vtanh.f32 %v312_v61  ;;  %563 = vmatpush.msrb.mxu0 %v1365_v10  ;;  %543 = vmatpush.msrb.mxu3 %v1363_v9 }
 0x143   :  { %564 = vmatpush.msrb.mxu0 %v1377_v14  ;;  %544 = vmatpush.msrb.mxu3 %v1367_v11 }
 0x145   :  { %565 = vmatpush.msrb.mxu0 %v1386_v17  ;;  %545 = vmatpush.msrb.mxu3 %v1379_v15 }
 0x147   :  { %v1690_v62 = vpop.eup %1136  ;;  %566 = vmatpush.msrb.mxu0 %v1395_v20  ;;  %546 = vmatpush.msrb.mxu3 %v1388_v18 }
 0x148   :  { %355 = vmatmul.f32.vlgmr.msrb.gmra.mxu2 %v1690_v62 }
 0x149   :  { %521 = vmatpush.msrb.mxu2 %v1337_v0  ;;  %567 = vmatpush.msrb.mxu0 %v1405_v23 }
 0x14a   :  { %547 = vmatpush.msrb.mxu3 %v1397_v21 }
 0x14b   :  { %522 = vmatpush.msrb.mxu2 %v1339_v1  ;;  %568 = vmatpush.msrb.mxu0 %v1415_v26 }
 0x14c   :  { %548 = vmatpush.msrb.mxu3 %v1407_v24 }
 0x14d   :  { %523 = vmatpush.msrb.mxu2 %v1342_v2  ;;  %569 = vmatpush.msrb.mxu0 %v1425_v29 }
 0x14e   :  { %549 = vmatpush.msrb.mxu3 %v1417_v27 }
 0x14f   :  { %524 = vmatpush.msrb.mxu2 %v1348_v4  ;;  %570 = vmatpush.msrb.mxu0 %v1435_v32 }
 0x150   :  { %550 = vmatpush.msrb.mxu3 %v1427_v30 }
 0x151   :  { %525 = vmatpush.msrb.mxu2 %v1357_v7  ;;  %571 = vmatpush.msrb.mxu0 %v1445_v35 }
 0x152   :  { %551 = vmatpush.msrb.mxu3 %v1437_v33 }
 0x153   :  { %526 = vmatpush.msrb.mxu2 %v1369_v12  ;;  %572 = vmatpush.msrb.mxu0 %v1455_v38 }
 0x154   :  { %552 = vmatpush.msrb.mxu3 %v1447_v36 }
 0x155   :  { %527 = vmatpush.msrb.mxu2 %v1381_v16  ;;  %573 = vmatpush.msrb.mxu0 %v1516_v43 }
 0x156   :  { %553 = vmatpush.msrb.mxu3 %v1514_v42 }
 0x157   :  { %528 = vmatpush.msrb.mxu2 %v1390_v19  ;;  %574 = vmatpush.msrb.mxu0 %v1524_v45 }
 0x158   :  { %554 = vmatpush.msrb.mxu3 %v1522_v44 }
 0x159   :  { %529 = vmatpush.msrb.mxu2 %v1400_v22  ;;  %575 = vmatpush.msrb.mxu0 %v1530_v47 }
 0x15a   :  { %555 = vmatpush.msrb.mxu3 %v1528_v46 }
 0x15b   :  { %530 = vmatpush.msrb.mxu2 %v1410_v25  ;;  %576 = vmatpush.msrb.mxu0 %v1538_v49 }
 0x15c   :  { %556 = vmatpush.msrb.mxu3 %v1536_v48 }
 0x15d   :  { %531 = vmatpush.msrb.mxu2 %v1420_v28  ;;  %577 = vmatpush.msrb.mxu0 %v1542_v51 }
 0x15e   :  { %557 = vmatpush.msrb.mxu3 %v1540_v50 }
 0x15f   :  { %532 = vmatpush.msrb.mxu2 %v1430_v31  ;;  %578 = vmatpush.msrb.mxu0 %v1554_v54 }
 0x160   :  { %558 = vmatpush.msrb.mxu3 %v1552_v53 }
 0x161   :  { %533 = vmatpush.msrb.mxu2 %v1440_v34 }
 0x163   :  { %534 = vmatpush.msrb.mxu2 %v1450_v37 }
 0x165   :  { %535 = vmatpush.msrb.mxu2 %v1458_v39 }
 0x167   :  { %536 = vmatpush.msrb.mxu2 %v1464_v40 }
 0x1bd   :  { %v402_v52 = vpop.f32.mrf.mxu0 }
 0x1be   :  { %v405_v55 = vadd.f32 %v402_v52, %v183_v41  ;;  %v184_v52 = vadd.f32 %v1593_v57, %v1735_v3 }
 0x1c0   :  { %1138 = vtanh.f32 %v405_v55 }
 0x1c3   :  { %v376_v59 = vpop.f32.mrf.mxu3 }
 0x1c6   :  { %v1139_v58 = vpop.eup %1138 }
 0x1c7   :  { %443 = vmatmul.f32.vlgmr.msra.gmra.mxu2 %v1139_v58  ;;  %469 = vmatmul.f32.vlgmr.msra.gmra.mxu3 %v1139_v58 }
 0x1c8   :  { %631 = vmatpush.msra.mxu3 %v1365_v10  ;;  %611 = vmatpush.msra.mxu2 %v1363_v9 }
 0x1ca   :  { %632 = vmatpush.msra.mxu3 %v1377_v14  ;;  %612 = vmatpush.msra.mxu2 %v1367_v11 }
 0x1cb   :  { %v356_v60 = vpop.f32.mrf.mxu2 }
 0x1cc   :  { %v377_v61 = vadd.f32 %v376_v59, %v356_v60  ;;  %633 = vmatpush.msra.mxu3 %v1386_v17  ;;  %613 = vmatpush.msra.mxu2 %v1379_v15 }
 0x1ce   :  { %v379_v63 = vadd.f32 %v1681_v56, %v377_v61  ;;  %634 = vmatpush.msra.mxu3 %v1395_v20  ;;  %614 = vmatpush.msra.mxu2 %v1388_v18 }
 0x1d0   :  { %1140 = vtanh.f32 %v379_v63  ;;  %635 = vmatpush.msra.mxu3 %v1405_v23  ;;  %615 = vmatpush.msra.mxu2 %v1397_v21 }
 0x1d2   :  { %636 = vmatpush.msra.mxu3 %v1415_v26  ;;  %616 = vmatpush.msra.mxu2 %v1407_v24 }
 0x1d4   :  { %637 = vmatpush.msra.mxu3 %v1425_v29  ;;  %617 = vmatpush.msra.mxu2 %v1417_v27 }
 0x1d6   :  { %v1761_v41 = vpop.eup %1140  ;;  %638 = vmatpush.msra.mxu3 %v1435_v32  ;;  %618 = vmatpush.msra.mxu2 %v1427_v30 }
 0x1d7   :  { %423 = vmatmul.f32.vlgmr.msra.gmra.mxu1 %v1761_v41 }
 0x1d8   :  { %589 = vmatpush.msra.mxu1 %v1337_v0  ;;  %639 = vmatpush.msra.mxu3 %v1445_v35 }
 0x1d9   :  { %619 = vmatpush.msra.mxu2 %v1437_v33 }
 0x1da   :  { %590 = vmatpush.msra.mxu1 %v1339_v1  ;;  %640 = vmatpush.msra.mxu3 %v1455_v38 }
 0x1db   :  { %620 = vmatpush.msra.mxu2 %v1447_v36 }
 0x1dc   :  { %591 = vmatpush.msra.mxu1 %v1342_v2  ;;  %641 = vmatpush.msra.mxu3 %v1516_v43 }
 0x1dd   :  { %621 = vmatpush.msra.mxu2 %v1514_v42 }
 0x1de   :  { %592 = vmatpush.msra.mxu1 %v1348_v4  ;;  %642 = vmatpush.msra.mxu3 %v1524_v45 }
 0x1df   :  { %622 = vmatpush.msra.mxu2 %v1522_v44 }
 0x1e0   :  { %593 = vmatpush.msra.mxu1 %v1357_v7  ;;  %643 = vmatpush.msra.mxu3 %v1530_v47 }
 0x1e1   :  { %623 = vmatpush.msra.mxu2 %v1528_v46 }
 0x1e2   :  { %594 = vmatpush.msra.mxu1 %v1369_v12  ;;  %644 = vmatpush.msra.mxu3 %v1538_v49 }
 0x1e3   :  { %624 = vmatpush.msra.mxu2 %v1536_v48 }
 0x1e4   :  { %595 = vmatpush.msra.mxu1 %v1381_v16  ;;  %645 = vmatpush.msra.mxu3 %v1542_v51 }
 0x1e5   :  { %625 = vmatpush.msra.mxu2 %v1540_v50 }
 0x1e6   :  { %596 = vmatpush.msra.mxu1 %v1390_v19  ;;  %646 = vmatpush.msra.mxu3 %v1554_v54 }
 0x1e7   :  { %626 = vmatpush.msra.mxu2 %v1552_v53 }
 0x1e8   :  { %597 = vmatpush.msra.mxu1 %v1400_v22 }
 0x1ea   :  { %598 = vmatpush.msra.mxu1 %v1410_v25 }
 0x1ec   :  { %599 = vmatpush.msra.mxu1 %v1420_v28 }
 0x1ee   :  { %600 = vmatpush.msra.mxu1 %v1430_v31 }
 0x1f0   :  { %601 = vmatpush.msra.mxu1 %v1440_v34 }
 0x1f2   :  { %602 = vmatpush.msra.mxu1 %v1450_v37 }
 0x1f4   :  { %603 = vmatpush.msra.mxu1 %v1458_v39 }
 0x1f6   :  { %604 = vmatpush.msra.mxu1 %v1464_v40 }
 0x24a   :  { %v470_v55 = vpop.f32.mrf.mxu3  ;;  %v444_v60 = vpop.f32.mrf.mxu2 }
 0x24b   :  { %v473_v58 = vadd.f32 %v470_v55, %v184_v52 }
 0x24d   :  { %1142 = vtanh.f32 %v473_v58 }
 0x253   :  { %v1143_v59 = vpop.eup %1142 }
 0x254   :  { %v424_v61 = vpop.f32.mrf.mxu1  ;;  %511 = vmatmul.f32.vlgmr.msrb.gmra.mxu1 %v1143_v59  ;;  %537 = vmatmul.f32.vlgmr.msrb.gmra.mxu2 %v1143_v59 }
 0x255   :  { %v445_v63 = vadd.f32 %v444_v60, %v424_v61  ;;  %699 = vmatpush.msrb.mxu2 %v1365_v10  ;;  %679 = vmatpush.msrb.mxu1 %v1363_v9 }
 0x257   :  { %v447_v13 = vadd.f32 %v1681_v56, %v445_v63  ;;  %700 = vmatpush.msrb.mxu2 %v1377_v14  ;;  %680 = vmatpush.msrb.mxu1 %v1367_v11 }
 0x259   :  { %1144 = vtanh.f32 %v447_v13  ;;  %701 = vmatpush.msrb.mxu2 %v1386_v17  ;;  %681 = vmatpush.msrb.mxu1 %v1379_v15  ;;  %v185_v13 = vadd.f32 %v1593_v57, %v1737_v5 }
 0x25b   :  { %702 = vmatpush.msrb.mxu2 %v1395_v20  ;;  %682 = vmatpush.msrb.mxu1 %v1388_v18 }
 0x25d   :  { %703 = vmatpush.msrb.mxu2 %v1405_v23  ;;  %683 = vmatpush.msrb.mxu1 %v1397_v21 }
 0x25f   :  { %v1811_v3 = vpop.eup %1144  ;;  %704 = vmatpush.msrb.mxu2 %v1415_v26  ;;  %684 = vmatpush.msrb.mxu1 %v1407_v24 }
 0x260   :  { %491 = vmatmul.f32.vlgmr.msra.gmra.mxu0 %v1811_v3 }
 0x261   :  { %657 = vmatpush.msra.mxu0 %v1337_v0  ;;  %705 = vmatpush.msrb.mxu2 %v1425_v29 }
 0x262   :  { %685 = vmatpush.msrb.mxu1 %v1417_v27 }
 0x263   :  { %658 = vmatpush.msra.mxu0 %v1339_v1  ;;  %706 = vmatpush.msrb.mxu2 %v1435_v32 }
 0x264   :  { %686 = vmatpush.msrb.mxu1 %v1427_v30 }
 0x265   :  { %659 = vmatpush.msra.mxu0 %v1342_v2  ;;  %707 = vmatpush.msrb.mxu2 %v1445_v35 }
 0x266   :  { %687 = vmatpush.msrb.mxu1 %v1437_v33 }
 0x267   :  { %660 = vmatpush.msra.mxu0 %v1348_v4  ;;  %708 = vmatpush.msrb.mxu2 %v1455_v38 }
 0x268   :  { %688 = vmatpush.msrb.mxu1 %v1447_v36 }
 0x269   :  { %661 = vmatpush.msra.mxu0 %v1357_v7  ;;  %709 = vmatpush.msrb.mxu2 %v1516_v43 }
 0x26a   :  { %689 = vmatpush.msrb.mxu1 %v1514_v42 }
 0x26b   :  { %662 = vmatpush.msra.mxu0 %v1369_v12  ;;  %710 = vmatpush.msrb.mxu2 %v1524_v45 }
 0x26c   :  { %690 = vmatpush.msrb.mxu1 %v1522_v44 }
 0x26d   :  { %663 = vmatpush.msra.mxu0 %v1381_v16  ;;  %711 = vmatpush.msrb.mxu2 %v1530_v47 }
 0x26e   :  { %691 = vmatpush.msrb.mxu1 %v1528_v46 }
 0x26f   :  { %664 = vmatpush.msra.mxu0 %v1390_v19  ;;  %712 = vmatpush.msrb.mxu2 %v1538_v49 }
 0x270   :  { %692 = vmatpush.msrb.mxu1 %v1536_v48 }
 0x271   :  { %665 = vmatpush.msra.mxu0 %v1400_v22  ;;  %713 = vmatpush.msrb.mxu2 %v1542_v51 }
 0x272   :  { %693 = vmatpush.msrb.mxu1 %v1540_v50 }
 0x273   :  { %666 = vmatpush.msra.mxu0 %v1410_v25  ;;  %714 = vmatpush.msrb.mxu2 %v1554_v54 }
 0x274   :  { %694 = vmatpush.msrb.mxu1 %v1552_v53 }
 0x275   :  { %667 = vmatpush.msra.mxu0 %v1420_v28 }
 0x277   :  { %668 = vmatpush.msra.mxu0 %v1430_v31 }
 0x279   :  { %669 = vmatpush.msra.mxu0 %v1440_v34 }
 0x27b   :  { %670 = vmatpush.msra.mxu0 %v1450_v37 }
 0x27d   :  { %671 = vmatpush.msra.mxu0 %v1458_v39 }
 0x27f   :  { %672 = vmatpush.msra.mxu0 %v1464_v40 }
 0x2d1   :  { %v512_v58 = vpop.f32.mrf.mxu1 }
 0x2d7   :  { %v538_v52 = vpop.f32.mrf.mxu2 }
 0x2d8   :  { %v541_v55 = vadd.f32 %v538_v52, %v185_v13  ;;  %v959_v13 = vld [vmem:[#allocation9 + $0x268] sm:$0xff] }
 0x2d9   :  { %v998_v52 = vld [vmem:[#allocation9 + $0x2e8] sm:$0xff] }
 0x2da   :  { %1146 = vtanh.f32 %v541_v55  ;;  %v958_v55 = vld [vmem:[#allocation9 + $0x260] sm:$0xff] }
 0x2dd   :  { %v492_v59 = vpop.f32.mrf.mxu0 }
 0x2de   :  { %v513_v60 = vadd.f32 %v512_v58, %v492_v59  ;;  %v997_v58 = vld [vmem:[#allocation9 + $0x2e0] sm:$0xff]  ;;  %v996_v59 = vld [vmem:[#allocation9 + $0x2d8] sm:$0xff] }
 0x2e0   :  { %v1147_v61 = vpop.eup %1146  ;;  %v515_v63 = vadd.f32 %v1681_v56, %v513_v60  ;;  %v956_v60 = vld [vmem:[#allocation9 + $0x250] sm:$0xff] }
 0x2e1   :  { %579 = vmatmul.f32.vlgmr.msrb.gmra.mxu0 %v1147_v61  ;;  %605 = vmatmul.f32.vlgmr.msra.gmra.mxu1 %v1147_v61  ;;  %v995_v61 = vld [vmem:[#allocation9 + $0x2d0] sm:$0xff] }
 0x2e2   :  { %1148 = vtanh.f32 %v515_v63  ;;  %767 = vmatpush.msra.mxu1 %v1365_v10  ;;  %747 = vmatpush.msrb.mxu0 %v1363_v9  ;;  %v806_v9 = vld [vmem:[#allocation9 + $0x70] sm:$0xff]  ;;  %v805_v10 = vld [vmem:[#allocation9 + $0x68] sm:$0xff] }
 0x2e3   :  { %v955_v63 = vld [vmem:[#allocation9 + $0x248] sm:$0xff] }
 0x2e4   :  { %768 = vmatpush.msra.mxu1 %v1377_v14  ;;  %748 = vmatpush.msrb.mxu0 %v1367_v11  ;;  %v804_v14 = vld [vmem:[#allocation9 + $0x60] sm:$0xff] }
 0x2e6   :  { %769 = vmatpush.msra.mxu1 %v1386_v17  ;;  %749 = vmatpush.msrb.mxu0 %v1379_v15 }
 0x2e8   :  { %v1861_v5 = vpop.eup %1148  ;;  %770 = vmatpush.msra.mxu1 %v1395_v20  ;;  %750 = vmatpush.msrb.mxu0 %v1388_v18  ;;  %v802_v18 = vld [vmem:[#allocation9 + $0x50] sm:$0xff]  ;;  %v800_v20 = vld [vmem:[#allocation9 + $0x40] sm:$0xff] }
 0x2e9   :  { %559 = vmatmul.f32.vlgmr.msrb.gmra.mxu3 %v1861_v5 }
 0x2ea   :  { %725 = vmatpush.msrb.mxu3 %v1337_v0  ;;  %771 = vmatpush.msra.mxu1 %v1405_v23  ;;  %v186_v0 = vadd.f32 %v1593_v57, %v1739_v6  ;;  %v999_v6 = vld [vmem:[#allocation9 + $0x2f0] sm:$0xff] }
 0x2eb   :  { %751 = vmatpush.msrb.mxu0 %v1397_v21  ;;  %v825_v21 = vld [vmem:[#allocation9 + $0xf8] sm:$0xff] }
 0x2ec   :  { %726 = vmatpush.msrb.mxu3 %v1339_v1  ;;  %772 = vmatpush.msra.mxu1 %v1415_v26  ;;  %v823_v26 = vld [vmem:[#allocation9 + $0xe8] sm:$0xff] }
 0x2ed   :  { %752 = vmatpush.msrb.mxu0 %v1407_v24  ;;  %v824_v24 = vld [vmem:[#allocation9 + $0xf0] sm:$0xff] }
 0x2ee   :  { %727 = vmatpush.msrb.mxu3 %v1342_v2  ;;  %773 = vmatpush.msra.mxu1 %v1425_v29  ;;  %v821_v29 = vld [vmem:[#allocation9 + $0xd8] sm:$0xff] }
 0x2ef   :  { %753 = vmatpush.msrb.mxu0 %v1417_v27  ;;  %v797_v27 = vld [vmem:[#allocation9 + $0x28] sm:$0xff] }
 0x2f0   :  { %728 = vmatpush.msrb.mxu3 %v1348_v4  ;;  %774 = vmatpush.msra.mxu1 %v1435_v32  ;;  %v807_v4 = vld [vmem:[#allocation9 + $0x78] sm:$0xff]  ;;  %v818_v32 = vld [vmem:[#allocation9 + $0xc0] sm:$0xff] }
 0x2f1   :  { %754 = vmatpush.msrb.mxu0 %v1427_v30  ;;  %v820_v30 = vld [vmem:[#allocation9 + $0xd0] sm:$0xff] }
 0x2f2   :  { %729 = vmatpush.msrb.mxu3 %v1357_v7  ;;  %775 = vmatpush.msra.mxu1 %v1445_v35  ;;  %v815_v35 = vld [vmem:[#allocation9 + $0xa8] sm:$0xff] }
 0x2f3   :  { %755 = vmatpush.msrb.mxu0 %v1437_v33  ;;  %v817_v33 = vld [vmem:[#allocation9 + $0xb8] sm:$0xff] }
 0x2f4   :  { %730 = vmatpush.msrb.mxu3 %v1369_v12  ;;  %776 = vmatpush.msra.mxu1 %v1455_v38  ;;  %v813_v38 = vld [vmem:[#allocation9 + $0x98] sm:$0xff] }
 0x2f5   :  { %756 = vmatpush.msrb.mxu0 %v1447_v36  ;;  %v814_v36 = vld [vmem:[#allocation9 + $0xa0] sm:$0xff] }
 0x2f6   :  { %731 = vmatpush.msrb.mxu3 %v1381_v16  ;;  %777 = vmatpush.msra.mxu1 %v1516_v43  ;;  %v803_v16 = vld [vmem:[#allocation9 + $0x58] sm:$0xff]  ;;  %v811_v43 = vld [vmem:[#allocation9 + $0x88] sm:$0xff] }
 0x2f7   :  { %757 = vmatpush.msrb.mxu0 %v1514_v42  ;;  %v794_v42 = vld [vmem:[#allocation9 + $0x10] sm:$0xff] }
 0x2f8   :  { %732 = vmatpush.msrb.mxu3 %v1390_v19  ;;  %778 = vmatpush.msra.mxu1 %v1524_v45  ;;  %v801_v19 = vld [vmem:[#allocation9 + $0x48] sm:$0xff]  ;;  %v810_v45 = vld [vmem:[#allocation9 + $0x80] sm:$0xff] }
 0x2f9   :  { %758 = vmatpush.msrb.mxu0 %v1522_v44  ;;  %v793_v44 = vld [vmem:[#allocation9 + $0x8] sm:$0xff] }
 0x2fa   :  { %733 = vmatpush.msrb.mxu3 %v1400_v22  ;;  %779 = vmatpush.msra.mxu1 %v1530_v47  ;;  %v799_v22 = vld [vmem:[#allocation9 + $0x38] sm:$0xff]  ;;  %v187_v47 = vadd.f32 %v1593_v57, %v1741_v8 }
 0x2fb   :  { %759 = vmatpush.msrb.mxu0 %v1528_v46  ;;  %v792_v46 = vld [vmem:[#allocation9] sm:$0xff]  ;;  %v883_v57 = vld [vmem:[#allocation9 + $0x178] sm:$0xff] }
 0x2fc   :  { %734 = vmatpush.msrb.mxu3 %v1410_v25  ;;  %780 = vmatpush.msra.mxu1 %v1538_v49  ;;  %v798_v25 = vld [vmem:[#allocation9 + $0x30] sm:$0xff]  ;;  %v957_v8 = vld [vmem:[#allocation9 + $0x258] sm:$0xff] }
 0x2fd   :  { %760 = vmatpush.msrb.mxu0 %v1536_v48 }
 0x2fe   :  { %735 = vmatpush.msrb.mxu3 %v1420_v28  ;;  %781 = vmatpush.msra.mxu1 %v1542_v51  ;;  %v822_v28 = vld [vmem:[#allocation9 + $0xe0] sm:$0xff]  ;;  %v1000_v51 = vld [vmem:[#allocation9 + $0x2f8] sm:$0xff] }
 0x2ff   :  { %761 = vmatpush.msrb.mxu0 %v1540_v50  ;;  %v961_v50 = vld [vmem:[#allocation9 + $0x278] sm:$0xff] }
 0x300   :  { %736 = vmatpush.msrb.mxu3 %v1430_v31  ;;  %782 = vmatpush.msra.mxu1 %v1554_v54  ;;  %v819_v31 = vld [vmem:[#allocation9 + $0xc8] sm:$0xff]  ;;  %v960_v54 = vld [vmem:[#allocation9 + $0x270] sm:$0xff] }
 0x301   :  { %762 = vmatpush.msrb.mxu0 %v1552_v53 }
 0x302   :  { %737 = vmatpush.msrb.mxu3 %v1440_v34  ;;  %v816_v34 = vld [vmem:[#allocation9 + $0xb0] sm:$0xff] }
 0x304   :  { %738 = vmatpush.msrb.mxu3 %v1450_v37  ;;  %v796_v37 = vld [vmem:[#allocation9 + $0x20] sm:$0xff] }
 0x306   :  { %739 = vmatpush.msrb.mxu3 %v1458_v39  ;;  %v795_v39 = vld [vmem:[#allocation9 + $0x18] sm:$0xff] }
 0x308   :  { %740 = vmatpush.msrb.mxu3 %v1464_v40  ;;  %v812_v40 = vld [vmem:[#allocation9 + $0x90] sm:$0xff] }
 0x35e   :  { %v606_v1 = vpop.f32.mrf.mxu1  ;;  %v580_v11 = vpop.f32.mrf.mxu0 }
 0x35f   :  { %v609_v2 = vadd.f32 %v606_v1, %v186_v0  ;;  %v994_v0 = vld [vmem:[#allocation9 + $0x2c8] sm:$0xff] }
 0x361   :  { %1150 = vtanh.f32 %v609_v2 }
 0x367   :  { %v1151_v7 = vpop.eup %1150 }
 0x368   :  { %647 = vmatmul.f32.vlgmr.msra.gmra.mxu3 %v1151_v7  ;;  %673 = vmatmul.f32.vlgmr.msra.gmra.mxu0 %v1151_v7  ;;  %v993_v7 = vld [vmem:[#allocation9 + $0x2c0] sm:$0xff] }
 0x369   :  { %846 = vmatpush.msra.mxu3 %v807_v4  ;;  %884 = vmatpush.msra.mxu0 %v883_v57  ;;  %v954_v4 = vld [vmem:[#allocation9 + $0x240] sm:$0xff] }
 0x36a   :  { %v1164_v57 = vld [vmem:[%s1940_s6] ss:$0 sm:$0xff] }
 0x36b   :  { %847 = vmatpush.msra.mxu3 %v806_v9 }
 0x36c   :  { %v560_v12 = vpop.f32.mrf.mxu3 }
 0x36d   :  { %v581_v15 = vadd.f32 %v580_v11, %v560_v12  ;;  %848 = vmatpush.msra.mxu3 %v805_v10  ;;  %v953_v10 = vld [vmem:[#allocation9 + $0x238] sm:$0xff]  ;;  %v991_v12 = vld [vmem:[#allocation9 + $0x2b0] sm:$0xff] }
 0x36e   :  { %v992_v11 = vld [vmem:[#allocation9 + $0x2b8] sm:$0xff] }
 0x36f   :  { %v583_v17 = vadd.f32 %v1681_v56, %v581_v15  ;;  %849 = vmatpush.msra.mxu3 %v804_v14  ;;  %v951_v14 = vld [vmem:[#allocation9 + $0x228] sm:$0xff] }
 0x370   :  { %v990_v15 = vld [vmem:[#allocation9 + $0x2a8] sm:$0xff] }
 0x371   :  { %1152 = vtanh.f32 %v583_v17  ;;  %850 = vmatpush.msra.mxu3 %v803_v16  ;;  %v950_v16 = vld [vmem:[#allocation9 + $0x220] sm:$0xff] }
 0x372   :  { %v989_v17 = vld [vmem:[#allocation9 + $0x2a0] sm:$0xff] }
 0x373   :  { %851 = vmatpush.msra.mxu3 %v802_v18  ;;  %v949_v18 = vld [vmem:[#allocation9 + $0x218] sm:$0xff] }
 0x375   :  { %852 = vmatpush.msra.mxu3 %v801_v19  ;;  %v988_v19 = vld [vmem:[#allocation9 + $0x298] sm:$0xff] }
 0x377   :  { %v1909_v23 = vpop.eup %1152  ;;  %853 = vmatpush.msra.mxu3 %v800_v20 }
 0x378   :  { %627 = vmatmul.f32.vlgmr.msra.gmra.mxu2 %v1909_v23 }
 0x379   :  { %826 = vmatpush.msra.mxu2 %v825_v21  ;;  %854 = vmatpush.msra.mxu3 %v799_v22  ;;  %v922_v21 = vld [vmem:[#allocation9 + $0x1f8] sm:$0xff]  ;;  %v948_v22 = vld [vmem:[#allocation9 + $0x210] sm:$0xff] }
 0x37b   :  { %827 = vmatpush.msra.mxu2 %v824_v24  ;;  %855 = vmatpush.msra.mxu3 %v798_v25  ;;  %v987_v24 = vld [vmem:[#allocation9 + $0x290] sm:$0xff] }
 0x37c   :  { %v921_v25 = vld [vmem:[#allocation9 + $0x1f0] sm:$0xff] }
 0x37d   :  { %828 = vmatpush.msra.mxu2 %v823_v26  ;;  %856 = vmatpush.msra.mxu3 %v797_v27  ;;  %v947_v26 = vld [vmem:[#allocation9 + $0x208] sm:$0xff] }
 0x37e   :  { %v986_v27 = vld [vmem:[#allocation9 + $0x288] sm:$0xff] }
 0x37f   :  { %829 = vmatpush.msra.mxu2 %v822_v28  ;;  %857 = vmatpush.msra.mxu3 %v796_v37  ;;  %v920_v28 = vld [vmem:[#allocation9 + $0x1e8] sm:$0xff] }
 0x380   :  { %v881_v37 = vld [vmem:[#allocation9 + $0x168] sm:$0xff] }
 0x381   :  { %830 = vmatpush.msra.mxu2 %v821_v29  ;;  %858 = vmatpush.msra.mxu3 %v795_v39  ;;  %v946_v29 = vld [vmem:[#allocation9 + $0x200] sm:$0xff] }
 0x382   :  { %v880_v39 = vld [vmem:[#allocation9 + $0x160] sm:$0xff] }
 0x383   :  { %831 = vmatpush.msra.mxu2 %v820_v30  ;;  %859 = vmatpush.msra.mxu3 %v794_v42  ;;  %v985_v30 = vld [vmem:[#allocation9 + $0x280] sm:$0xff]  ;;  %v879_v42 = vld [vmem:[#allocation9 + $0x158] sm:$0xff] }
 0x385   :  { %832 = vmatpush.msra.mxu2 %v819_v31  ;;  %860 = vmatpush.msra.mxu3 %v793_v44  ;;  %v919_v31 = vld [vmem:[#allocation9 + $0x1e0] sm:$0xff] }
 0x386   :  { %v911_v44 = vld [vmem:[#allocation9 + $0x1a0] sm:$0xff] }
 0x387   :  { %833 = vmatpush.msra.mxu2 %v818_v32  ;;  %861 = vmatpush.msra.mxu3 %v792_v46  ;;  %v918_v32 = vld [vmem:[#allocation9 + $0x1d8] sm:$0xff] }
 0x388   :  { %v910_v46 = vld [vmem:[#allocation9 + $0x198] sm:$0xff] }
 0x389   :  { %834 = vmatpush.msra.mxu2 %v817_v33  ;;  %v917_v33 = vld [vmem:[#allocation9 + $0x1d0] sm:$0xff] }
 0x38b   :  { %835 = vmatpush.msra.mxu2 %v816_v34  ;;  %v916_v34 = vld [vmem:[#allocation9 + $0x1c8] sm:$0xff] }
 0x38d   :  { %836 = vmatpush.msra.mxu2 %v815_v35  ;;  %v882_v35 = vld [vmem:[#allocation9 + $0x170] sm:$0xff] }
 0x38e   :  { %885 = vmatpush.msra.mxu0 %v882_v35  ;;  %v1065_v35 = vld [vmem:[#allocation9 + $0x390] sm:$0xff] }
 0x38f   :  { %837 = vmatpush.msra.mxu2 %v814_v36  ;;  %v915_v36 = vld [vmem:[#allocation9 + $0x1c0] sm:$0xff] }
 0x390   :  { %886 = vmatpush.msra.mxu0 %v881_v37  ;;  %v1063_v37 = vld [vmem:[#allocation9 + $0x380] sm:$0xff] }
 0x391   :  { %838 = vmatpush.msra.mxu2 %v813_v38  ;;  %v914_v38 = vld [vmem:[#allocation9 + $0x1b8] sm:$0xff] }
 0x392   :  { %887 = vmatpush.msra.mxu0 %v880_v39 }
 0x393   :  { %839 = vmatpush.msra.mxu2 %v812_v40  ;;  %v913_v40 = vld [vmem:[#allocation9 + $0x1b0] sm:$0xff] }
 0x394   :  { %888 = vmatpush.msra.mxu0 %v879_v42  ;;  %v1165_v42 = vld [vmem:[%s1941_s7] ss:$0 sm:$0xff] }
 0x395   :  { %840 = vmatpush.msra.mxu2 %v811_v43  ;;  %v878_v43 = vld [vmem:[#allocation9 + $0x150] sm:$0xff] }
 0x396   :  { %889 = vmatpush.msra.mxu0 %v878_v43 }
 0x397   :  { %841 = vmatpush.msra.mxu2 %v810_v45  ;;  %v877_v45 = vld [vmem:[#allocation9 + $0x148] sm:$0xff] }
 0x398   :  { %890 = vmatpush.msra.mxu0 %v877_v45 }
 0x3e5   :  { %v674_v48 = vpop.f32.mrf.mxu0 }
 0x3e6   :  { %v677_v49 = vadd.f32 %v674_v48, %v187_v47  ;;  %v876_v47 = vld [vmem:[#allocation9 + $0x140] sm:$0xff]  ;;  %v909_v48 = vld [vmem:[#allocation9 + $0x190] sm:$0xff] }
 0x3e7   :  { %891 = vmatpush.msra.mxu0 %v876_v47 }
 0x3e8   :  { %1154 = vtanh.f32 %v677_v49  ;;  %v875_v49 = vld [vmem:[#allocation9 + $0x138] sm:$0xff] }
 0x3e9   :  { %892 = vmatpush.msra.mxu0 %v875_v49 }
 0x3eb   :  { %v648_v1 = vpop.f32.mrf.mxu3 }
 0x3ee   :  { %v1155_v53 = vpop.eup %1154 }
 0x3ef   :  { %715 = vmatmul.f32.vlgmr.msrb.gmra.mxu2 %v1155_v53  ;;  %741 = vmatmul.f32.vlgmr.msrb.gmra.mxu3 %v1155_v53  ;;  %v907_v53 = vld [vmem:[#allocation9 + $0x180] sm:$0xff] }
 0x3f0   :  { %962 = vmatpush.msrb.mxu2 %v961_v50  ;;  %1001 = vmatpush.msrb.mxu3 %v1000_v51  ;;  %v908_v50 = vld [vmem:[#allocation9 + $0x188] sm:$0xff]  ;;  %v874_v51 = vld [vmem:[#allocation9 + $0x130] sm:$0xff] }
 0x3f1   :  { %893 = vmatpush.msra.mxu0 %v874_v51 }
 0x3f2   :  { %963 = vmatpush.msrb.mxu2 %v960_v54  ;;  %1002 = vmatpush.msrb.mxu3 %v999_v6  ;;  %v873_v54 = vld [vmem:[#allocation9 + $0x128] sm:$0xff]  ;;  %v872_v6 = vld [vmem:[#allocation9 + $0x120] sm:$0xff] }
 0x3f3   :  { %894 = vmatpush.msra.mxu0 %v873_v54 }
 0x3f4   :  { %964 = vmatpush.msrb.mxu2 %v959_v13  ;;  %1003 = vmatpush.msrb.mxu3 %v998_v52  ;;  %v871_v13 = vld [vmem:[#allocation9 + $0x118] sm:$0xff]  ;;  %v870_v52 = vld [vmem:[#allocation9 + $0x110] sm:$0xff] }
 0x3f5   :  { %895 = vmatpush.msra.mxu0 %v872_v6 }
 0x3f6   :  { %965 = vmatpush.msrb.mxu2 %v958_v55  ;;  %1004 = vmatpush.msrb.mxu3 %v997_v58  ;;  %v869_v55 = vld [vmem:[#allocation9 + $0x108] sm:$0xff]  ;;  %v868_v58 = vld [vmem:[#allocation9 + $0x100] sm:$0xff] }
 0x3f7   :  { %842 = vmatmul.f32.vlgmr.msra.gmra.mxu2 %v1761_v41  ;;  %862 = vmatmul.f32.vlgmr.msra.gmra.mxu3 %v1690_v62  ;;  %v952_v62 = vld [vmem:[#allocation9 + $0x230] sm:$0xff] }
 0x3f8   :  { %966 = vmatpush.msrb.mxu2 %v957_v8  ;;  %1005 = vmatpush.msrb.mxu3 %v996_v59  ;;  %v1945_v8 = vld [vmem:[#allocation14_spill] sm:$0xff] }
 0x3f9   :  { %896 = vmatpush.msra.mxu0 %v871_v13  ;;  %v188_v59 = vadd.f32 %v1164_v57, %v1945_v8 }
 0x3fa   :  { %967 = vmatpush.msrb.mxu2 %v956_v60  ;;  %1006 = vmatpush.msrb.mxu3 %v995_v61 }
 0x3fb   :  { %v628_v2 = vpop.f32.mrf.mxu2  ;;  %897 = vmatpush.msra.mxu0 %v870_v52 }
 0x3fc   :  { %v649_v9 = vadd.f32 %v648_v1, %v628_v2  ;;  %968 = vmatpush.msrb.mxu2 %v955_v63  ;;  %1007 = vmatpush.msrb.mxu3 %v994_v0 }
 0x3fd   :  { %898 = vmatpush.msra.mxu0 %v869_v55  ;;  %v1131_v55 = vld [vmem:[%s1942_s8] ss:$0 sm:$0xff] }
 0x3fe   :  { %v651_v41 = vadd.f32 %v1681_v56, %v649_v9  ;;  %969 = vmatpush.msrb.mxu2 %v954_v4  ;;  %1008 = vmatpush.msrb.mxu3 %v993_v7  ;;  %v1039_v7 = vld [vmem:[#allocation9 + $0x378] sm:$0xff] }
 0x3ff   :  { %899 = vmatpush.msra.mxu0 %v868_v58 }
 0x400   :  { %1156 = vtanh.f32 %v651_v41  ;;  %970 = vmatpush.msrb.mxu2 %v953_v10  ;;  %1009 = vmatpush.msrb.mxu3 %v992_v11  ;;  %v1038_v10 = vld [vmem:[#allocation9 + $0x370] sm:$0xff]  ;;  %v1037_v11 = vld [vmem:[#allocation9 + $0x368] sm:$0xff]  ;;  %v1036_v41 = vld [vmem:[#allocation9 + $0x360] sm:$0xff] }
 0x402   :  { %971 = vmatpush.msrb.mxu2 %v952_v62  ;;  %1010 = vmatpush.msrb.mxu3 %v991_v12  ;;  %v1035_v62 = vld [vmem:[#allocation9 + $0x358] sm:$0xff]  ;;  %v1034_v12 = vld [vmem:[#allocation9 + $0x350] sm:$0xff] }
 0x404   :  { %972 = vmatpush.msrb.mxu2 %v951_v14  ;;  %1011 = vmatpush.msrb.mxu3 %v990_v15  ;;  %v1032_v14 = vld [vmem:[#allocation9 + $0x340] sm:$0xff]  ;;  %v1030_v15 = vld [vmem:[#allocation9 + $0x330] sm:$0xff] }
 0x406   :  { %v1157_v20 = vpop.eup %1156  ;;  %973 = vmatpush.msrb.mxu2 %v950_v16  ;;  %1012 = vmatpush.msrb.mxu3 %v989_v17  ;;  %v1029_v16 = vld [vmem:[#allocation9 + $0x328] sm:$0xff]  ;;  %v1028_v17 = vld [vmem:[#allocation9 + $0x320] sm:$0xff] }
 0x407   :  { %695 = vmatmul.f32.vlgmr.msrb.gmra.mxu1 %v1157_v20 }
 0x408   :  { %974 = vmatpush.msrb.mxu2 %v949_v18  ;;  %1013 = vmatpush.msrb.mxu3 %v988_v19  ;;  %v1027_v18 = vld [vmem:[#allocation9 + $0x318] sm:$0xff]  ;;  %v1026_v19 = vld [vmem:[#allocation9 + $0x310] sm:$0xff] }
 0x409   :  { %923 = vmatpush.msrb.mxu1 %v922_v21  ;;  %v1078_v21 = vld [vmem:[#allocation9 + $0x3f8] sm:$0xff] }
 0x40a   :  { %975 = vmatpush.msrb.mxu2 %v948_v22  ;;  %1014 = vmatpush.msrb.mxu3 %v987_v24  ;;  %v1077_v22 = vld [vmem:[#allocation9 + $0x3f0] sm:$0xff]  ;;  %v1076_v24 = vld [vmem:[#allocation9 + $0x3e8] sm:$0xff] }
 0x40b   :  { %924 = vmatpush.msrb.mxu1 %v921_v25  ;;  %v1075_v25 = vld [vmem:[#allocation9 + $0x3e0] sm:$0xff] }
 0x40c   :  { %976 = vmatpush.msrb.mxu2 %v947_v26  ;;  %1015 = vmatpush.msrb.mxu3 %v986_v27  ;;  %v1074_v26 = vld [vmem:[#allocation9 + $0x3d8] sm:$0xff]  ;;  %v1073_v27 = vld [vmem:[#allocation9 + $0x3d0] sm:$0xff] }
 0x40d   :  { %925 = vmatpush.msrb.mxu1 %v920_v28  ;;  %v1072_v28 = vld [vmem:[#allocation9 + $0x3c8] sm:$0xff] }
 0x40e   :  { %977 = vmatpush.msrb.mxu2 %v946_v29  ;;  %1016 = vmatpush.msrb.mxu3 %v985_v30  ;;  %v1071_v29 = vld [vmem:[#allocation9 + $0x3c0] sm:$0xff]  ;;  %v1070_v30 = vld [vmem:[#allocation9 + $0x3b8] sm:$0xff] }
 0x40f   :  { %978 = vmatmul.f32.vlgmr.msrb.gmra.mxu2 %v1909_v23  ;;  %1017 = vmatmul.f32.vlgmr.msrb.gmra.mxu3 %v1157_v20  ;;  %v912_v23 = vld [vmem:[#allocation9 + $0x1a8] sm:$0xff] }
 0x410   :  { %926 = vmatpush.msrb.mxu1 %v919_v31  ;;  %v1025_v20 = vld [vmem:[#allocation9 + $0x308] sm:$0xff]  ;;  %v1069_v31 = vld [vmem:[#allocation9 + $0x3b0] sm:$0xff] }
 0x412   :  { %927 = vmatpush.msrb.mxu1 %v918_v32  ;;  %v1068_v32 = vld [vmem:[#allocation9 + $0x3a8] sm:$0xff] }
 0x414   :  { %928 = vmatpush.msrb.mxu1 %v917_v33  ;;  %v1067_v33 = vld [vmem:[#allocation9 + $0x3a0] sm:$0xff] }
 0x416   :  { %929 = vmatpush.msrb.mxu1 %v916_v34  ;;  %v1066_v34 = vld [vmem:[#allocation9 + $0x398] sm:$0xff] }
 0x418   :  { %930 = vmatpush.msrb.mxu1 %v915_v36  ;;  %v1064_v36 = vld [vmem:[#allocation9 + $0x388] sm:$0xff] }
 0x41a   :  { %931 = vmatpush.msrb.mxu1 %v914_v38 }
 0x41c   :  { %932 = vmatpush.msrb.mxu1 %v913_v40 }
 0x41e   :  { %933 = vmatpush.msrb.mxu1 %v912_v23 }
 0x420   :  { %934 = vmatpush.msrb.mxu1 %v911_v44 }
 0x422   :  { %935 = vmatpush.msrb.mxu1 %v910_v46 }
 0x424   :  { %936 = vmatpush.msrb.mxu1 %v909_v48 }
 0x426   :  { %937 = vmatpush.msrb.mxu1 %v908_v50 }
 0x428   :  { %938 = vmatpush.msrb.mxu1 %v907_v53 }
 0x472   :  { %v742_v60 = vpop.f32.mrf.mxu3  ;;  %v716_v0 = vpop.f32.mrf.mxu2 }
 0x473   :  { %v745_v61 = vadd.f32 %v742_v60, %v188_v59 }
 0x475   :  { %1158 = vtanh.f32 %v745_v61 }
 0x47a   :  { %v843_v44 = vpop.f32.mrf.mxu2  ;;  %v863_v45 = vpop.f32.mrf.mxu3 }
 0x47b   :  { %v1159_v63 = vpop.eup %1158  ;;  %v864_v47 = vadd.f32 %v863_v45, %v843_v44 }
 0x47c   :  { %783 = vmatmul.f32.vlgmr.msra.gmra.mxu1 %v1159_v63 }
 0x47d   :  { %1079 = vmatpush.msra.mxu1 %v1078_v21 }
 0x47f   :  { %1080 = vmatpush.msra.mxu1 %v1077_v22 }
 0x481   :  { %1081 = vmatpush.msra.mxu1 %v1076_v24 }
 0x483   :  { %1082 = vmatpush.msra.mxu1 %v1075_v25 }
 0x484   :  { %v696_v1 = vpop.f32.mrf.mxu1  ;;  %939 = vmatmul.f32.vlgmr.msrb.gmra.mxu1 %v1861_v5  ;;  %v1033_v5 = vld [vmem:[#allocation9 + $0x348] sm:$0xff] }
 0x485   :  { %v717_v2 = vadd.f32 %v716_v0, %v696_v1  ;;  %1083 = vmatpush.msra.mxu1 %v1074_v26 }
 0x487   :  { %v719_v4 = vadd.f32 %v1681_v56, %v717_v2  ;;  %v1031_v56 = vld [vmem:[#allocation9 + $0x338] sm:$0xff]  ;;  %1084 = vmatpush.msra.mxu1 %v1073_v27 }
 0x489   :  { %1160 = vtanh.f32 %v719_v4  ;;  %1085 = vmatpush.msra.mxu1 %v1072_v28 }
 0x48b   :  { %1086 = vmatpush.msra.mxu1 %v1071_v29 }
 0x48d   :  { %1087 = vmatpush.msra.mxu1 %v1070_v30 }
 0x48f   :  { %v1161_v9 = vpop.eup %1160  ;;  %1088 = vmatpush.msra.mxu1 %v1069_v31 }
 0x490   :  { %763 = vmatmul.f32.vlgmr.msrb.gmra.mxu0 %v1161_v9 }
 0x491   :  { %1040 = vmatpush.msrb.mxu0 %v1039_v7  ;;  %1089 = vmatpush.msra.mxu1 %v1068_v32 }
 0x492   :  { %v979_v51 = vpop.f32.mrf.mxu2  ;;  %v1018_v54 = vpop.f32.mrf.mxu3 }
 0x493   :  { %1041 = vmatpush.msrb.mxu0 %v1038_v10  ;;  %1090 = vmatpush.msra.mxu1 %v1067_v33 }
 0x495   :  { %1042 = vmatpush.msrb.mxu0 %v1037_v11  ;;  %1091 = vmatpush.msra.mxu1 %v1066_v34 }
 0x497   :  { %1043 = vmatpush.msrb.mxu0 %v1036_v41  ;;  %1092 = vmatpush.msra.mxu1 %v1065_v35 }
 0x498   :  { %900 = vmatmul.f32.vlgmr.msra.gmra.mxu0 %v1811_v3  ;;  %v1024_v3 = vld [vmem:[#allocation9 + $0x300] sm:$0xff] }
 0x499   :  { %1044 = vmatpush.msrb.mxu0 %v1035_v62  ;;  %1093 = vmatpush.msra.mxu1 %v1064_v36 }
 0x49b   :  { %1045 = vmatpush.msrb.mxu0 %v1034_v12  ;;  %1094 = vmatpush.msra.mxu1 %v1063_v37 }
 0x49d   :  { %1046 = vmatpush.msrb.mxu0 %v1033_v5 }
 0x49f   :  { %1047 = vmatpush.msrb.mxu0 %v1032_v14 }
 0x4a1   :  { %1048 = vmatpush.msrb.mxu0 %v1031_v56 }
 0x4a3   :  { %1049 = vmatpush.msrb.mxu0 %v1030_v15 }
 0x4a5   :  { %1050 = vmatpush.msrb.mxu0 %v1029_v16 }
 0x4a7   :  { %1051 = vmatpush.msrb.mxu0 %v1028_v17 }
 0x4a9   :  { %1052 = vmatpush.msrb.mxu0 %v1027_v18 }
 0x4ab   :  { %1053 = vmatpush.msrb.mxu0 %v1026_v19 }
 0x4ad   :  { %1054 = vmatpush.msrb.mxu0 %v1025_v20 }
 0x4af   :  { %1055 = vmatpush.msrb.mxu0 %v1024_v3 }
 0x4b0   :  { %1056 = vmatmul.f32.vlgmr.msrb.gmra.mxu0 %v1161_v9 }
 0x4f9   :  { %v784_v38 = vpop.f32.mrf.mxu1 }
 0x501   :  { %v940_v49 = vpop.f32.mrf.mxu1 }
 0x50d   :  { %v764_v39 = vpop.f32.mrf.mxu0 }
 0x50e   :  { %v785_v40 = vadd.f32 %v784_v38, %v764_v39 }
 0x510   :  { %v787_v23 = vadd.f32 %v1165_v42, %v785_v40 }
 0x512   :  { %1162 = vtanh.f32 %v787_v23 }
 0x515   :  { %v901_v46 = vpop.f32.mrf.mxu0 }
 0x516   :  { %v904_v48 = vadd.f32 %v901_v46, %v864_v47 }
 0x518   :  { %v1163_v43 = vpop.eup %1162  ;;  %v943_v50 = vadd.f32 %v940_v49, %v904_v48 }
 0x519   :  { %1095 = vmatmul.f32.vlgmr.msra.gmra.mxu1 %v1163_v43 }
 0x51a   :  { %v982_v53 = vadd.f32 %v979_v51, %v943_v50 }
 0x51c   :  { %v1021_v13 = vadd.f32 %v1018_v54, %v982_v53 }
 0x52d   :  { %v1057_v6 = vpop.f32.mrf.mxu0 }
 0x52e   :  { %v1060_v52 = vadd.f32 %v1057_v6, %v1021_v13 }
 0x596   :  { %v1096_v58 = vpop.f32.mrf.mxu1 }
 0x597   :  { %v1099_v57 = vadd.f32 %v1096_v58, %v1060_v52 }
 0x599   :  { %v1104_v8 = vadd.f32 %v1131_v55, %v1099_v57 }
 0x59b   :  { %1105 = vst [vmem:[%s1943_s9] sm:$0xff] %v1104_v8 }
 0x59c   :  { %1110 = vsyncpa [#allocation5], 1 }
 0x59d   :  { %1111 = vsyncpa [#allocation7], 1 }
 0x59e   :  { %1112 = vsyncpa [#allocation10], 1 }

</bundles_post_ra>
